<compile_context>
chip_gen: v6e
topology: v6e:2x2x1
jax: 0.10.0
libtpu: 0.0.40
codegen_flags: <defaults>
</compile_context>

<pallas_src>
import jax
import jax.numpy as jnp
from jax.experimental import pallas as pl
from jax.experimental.pallas import tpu as pltpu


# ----------------------------------------------------------------------------
# Pallas kernel: one grid step == one (sample, tile of TH output rows).
#   xp_ref : (C, 2*TH, 2W)  x_pre rows feeding this tile of output rows
#   xc_ref : (C, TH, W)     x_cur tile
#   s0_ref : (2W, W)        selects even columns  (S0[2w,   w] = 1)
#   s1_ref : (2W, W)        selects odd  columns  (S1[2w+1, w] = 1)
#   w_ref  : (C, C)         1x1 conv weight with BN scale folded in
#   b_ref  : (C, 1)         folded BN bias
#   out_ref: (C, TH, W)
# ----------------------------------------------------------------------------
def spcm5_kernel(xp_ref, xc_ref, s0_ref, s1_ref, w_ref, b_ref, out_ref):
    th = xc_ref.shape[1]
    w = w_ref[...]
    b = b_ref[...]
    s0 = s0_ref[...]
    s1 = s1_ref[...]
    for t in range(th):  # static unroll; TH is small (8)
        # vertical half of the 2x2 max-pool: source rows 2t and 2t+1
        row_max = jnp.maximum(xp_ref[:, 2 * t, :], xp_ref[:, 2 * t + 1, :])   # (C, 2W)
        # horizontal half: exact 0/1 selection matmuls on the MXU (it has
        # plenty of slack in this memory-bound kernel), then element max.
        pre_ds = jnp.maximum(
            jnp.dot(row_max, s0, preferred_element_type=jnp.float32),
            jnp.dot(row_max, s1, preferred_element_type=jnp.float32))         # (C, W)
        xc = xc_ref[:, t, :]                                                  # (C, W)
        # 1x1 conv (BN scale folded into w) + BN bias, ReLU, sigmoid gate
        y = jnp.dot(w, pre_ds + xc, preferred_element_type=jnp.float32) + b   # (C, W)
        y = jnp.maximum(y, 0.0)
        gate = jax.nn.sigmoid(y)
        # out = gate * x_cur + x_cur  ==  x_cur * (gate + 1)
        out_ref[:, t, :] = xc * (gate + 1.0)


def spcm5_forward(x_pre, x_cur, conv_w, bn_scale, bn_bias):
    """x_pre: (N,C,2H,2W) f32, x_cur: (N,C,H,W) f32 -> (N,C,H,W) f32."""
    N, C, H, W = x_cur.shape
    assert x_pre.shape == (N, C, 2 * H, 2 * W)
    TH = 8 if H % 8 == 0 else H          # rows of output per grid step
    n_h = H // TH

    # Fold inference-mode BN scale into the conv weight; keep only the bias.
    w_scaled = (bn_scale[:, None] * conv_w).astype(jnp.float32)
    bias = bn_bias.reshape(C, 1).astype(jnp.float32)

    # Exact 0/1 column-selection matrices (shape-only constants, a few KiB).
    cols = jnp.arange(2 * W)[:, None]
    outs = jnp.arange(W)[None, :]
    s_even = (cols == 2 * outs).astype(jnp.float32)        # (2W, W)
    s_odd = (cols == 2 * outs + 1).astype(jnp.float32)     # (2W, W)

    out = pl.pallas_call(
        spcm5_kernel,
        out_shape=jax.ShapeDtypeStruct((N, C, H, W), jnp.float32),
        grid_spec=pltpu.PrefetchScalarGridSpec(
            num_scalar_prefetch=0,
            grid=(N, n_h),
            in_specs=[
                pl.BlockSpec((None, C, 2 * TH, 2 * W), lambda n, h: (n, 0, h, 0)),
                pl.BlockSpec((None, C, TH, W), lambda n, h: (n, 0, h, 0)),
                pl.BlockSpec((2 * W, W), lambda n, h: (0, 0)),
                pl.BlockSpec((2 * W, W), lambda n, h: (0, 0)),
                pl.BlockSpec((C, C), lambda n, h: (0, 0)),
                pl.BlockSpec((C, 1), lambda n, h: (0, 0)),
            ],
            out_specs=pl.BlockSpec((None, C, TH, W), lambda n, h: (n, 0, h, 0)),
        ),
        compiler_params=pltpu.CompilerParams(
            dimension_semantics=("parallel", "parallel")),
    )(x_pre, x_cur, s_even, s_odd, w_scaled, bias)
    return out


def spcm5_reference(x_pre, x_cur, conv_w, bn_scale, bn_bias):
    """Pure-JAX reference with identical math (sanity check)."""
    N, C, H, W = x_cur.shape
    pre_ds = x_pre.reshape(N, C, H, 2, W, 2).max(axis=(3, 5))   # MaxPool2d(2, 2)
    s = pre_ds + x_cur
    # BN(conv(s)) == (scale*W) @ s + bias  (inference-mode BN, folded)
    w_scaled = bn_scale[:, None] * conv_w
    y = jnp.einsum('oc,nchw->nohw', w_scaled, s) + bn_bias[None, :, None, None]
    y = jnp.maximum(y, 0.0)
    gate = jax.nn.sigmoid(y)
    return gate * x_cur + x_cur


if __name__ == "__main__":
    N, C, H, W = 2, 4, 16, 16
    key = jax.random.PRNGKey(0)
    k1, k2, k3, k4, k5, k6, k7 = jax.random.split(key, 7)

    # x_pre is the higher-resolution input (downsampled 2x inside the module).
    # Quantise x_pre to the bf16 grid so the exact max-pool in the reference and
    # the selection-matmul max-pool in the kernel agree even if the backend runs
    # f32 matmuls with bf16 operands under default matmul precision.
    x_pre = jax.random.normal(k1, (N, C, 2 * H, 2 * W), dtype=jnp.float32)
    x_pre = x_pre.astype(jnp.bfloat16).astype(jnp.float32)
    x_cur = jax.random.normal(k2, (N, C, H, W), dtype=jnp.float32)

    # parameters (deterministic synthetic init)
    conv_w = 0.1 * jax.random.normal(k3, (C, C), dtype=jnp.float32)  # Conv2d(C,C,1,bias=False)
    gamma = 1.0 + 0.1 * jax.random.normal(k4, (C,), dtype=jnp.float32)
    beta = 0.1 * jax.random.normal(k5, (C,), dtype=jnp.float32)
    running_mean = 0.1 * jax.random.normal(k6, (C,), dtype=jnp.float32)
    running_var = 1.0 + 0.2 * jnp.abs(jax.random.normal(k7, (C,), dtype=jnp.float32))
    eps = 1e-3
    # TODO(synk): training-mode BatchNorm (batch statistics) not implemented;
    # BN is folded as an inference-mode per-channel affine (running stats).
    bn_scale = gamma / jnp.sqrt(running_var + eps)
    bn_bias = beta - running_mean * bn_scale

    out = spcm5_forward(x_pre, x_cur, conv_w, bn_scale, bn_bias)
    out = jax.block_until_ready(out)

    ref = spcm5_reference(x_pre, x_cur, conv_w, bn_scale, bn_bias)
    assert out.shape == (N, C, H, W)
    assert jnp.allclose(out, ref, rtol=1e-4, atol=1e-4), "mismatch vs reference"

    print("KERNEL_OK")
</pallas_src>

<mosaic_0001>
module attributes {stable_mosaic.version = 11 : i64} {
  func.func @spcm5_kernel(%arg0: i32, %arg1: i32, %arg2: memref<1x4x16x32xf32, #tpu.memory_space<vmem>>, %arg3: memref<1x4x8x16xf32, #tpu.memory_space<vmem>>, %arg4: memref<32x16xf32, #tpu.memory_space<vmem>>, %arg5: memref<32x16xf32, #tpu.memory_space<vmem>>, %arg6: memref<4x4xf32, #tpu.memory_space<vmem>>, %arg7: memref<4x1xf32, #tpu.memory_space<vmem>>, %arg8: memref<1x4x8x16xf32, #tpu.memory_space<vmem>>) attributes {dimension_semantics = [#tpu.dimension_semantics<parallel>, #tpu.dimension_semantics<parallel>], iteration_bounds = array<i64: 2, 2>, scalar_prefetch = 0 : i64, scratch_operands = 0 : i64, tpu.core_type = #tpu.core_type<tc>, window_params = [{transform_indices = @transform_0, window_bounds = array<i64: 1, 4, 16, 32>}, {transform_indices = @transform_1, window_bounds = array<i64: 1, 4, 8, 16>}, {pipeline_mode = #tpu.pipeline_mode<synchronous>, transform_indices = @transform_2, window_bounds = array<i64: 32, 16>}, {pipeline_mode = #tpu.pipeline_mode<synchronous>, transform_indices = @transform_3, window_bounds = array<i64: 32, 16>}, {pipeline_mode = #tpu.pipeline_mode<synchronous>, transform_indices = @transform_4, window_bounds = array<i64: 4, 4>}, {pipeline_mode = #tpu.pipeline_mode<synchronous>, transform_indices = @transform_5, window_bounds = array<i64: 4, 1>}, {transform_indices = @transform_6, window_bounds = array<i64: 1, 4, 8, 16>}]} {
    %c0 = arith.constant 0 : index
    %c0_0 = arith.constant 0 : index
    %0 = vector.load %arg6[%c0, %c0_0] : memref<4x4xf32, #tpu.memory_space<vmem>>, vector<4x4xf32>
    %c0_1 = arith.constant 0 : index
    %c0_2 = arith.constant 0 : index
    %1 = vector.load %arg7[%c0_1, %c0_2] : memref<4x1xf32, #tpu.memory_space<vmem>>, vector<4x1xf32>
    %c0_3 = arith.constant 0 : index
    %c0_4 = arith.constant 0 : index
    %2 = vector.load %arg4[%c0_3, %c0_4] : memref<32x16xf32, #tpu.memory_space<vmem>>, vector<32x16xf32>
    %c0_5 = arith.constant 0 : index
    %c0_6 = arith.constant 0 : index
    %3 = vector.load %arg5[%c0_5, %c0_6] : memref<32x16xf32, #tpu.memory_space<vmem>>, vector<32x16xf32>
    %c0_7 = arith.constant 0 : index
    %c0_8 = arith.constant 0 : index
    %c0_9 = arith.constant 0 : index
    %c0_10 = arith.constant 0 : index
    %4 = vector.load %arg2[%c0_7, %c0_8, %c0_9, %c0_10] : memref<1x4x16x32xf32, #tpu.memory_space<vmem>>, vector<1x4x1x32xf32>
    %5 = vector.shape_cast %4 : vector<1x4x1x32xf32> to vector<4x32xf32>
    %c0_11 = arith.constant 0 : index
    %c0_12 = arith.constant 0 : index
    %c1 = arith.constant 1 : index
    %c0_13 = arith.constant 0 : index
    %6 = vector.load %arg2[%c0_11, %c0_12, %c1, %c0_13] : memref<1x4x16x32xf32, #tpu.memory_space<vmem>>, vector<1x4x1x32xf32>
    %7 = vector.shape_cast %6 : vector<1x4x1x32xf32> to vector<4x32xf32>
    %8 = arith.maximumf %5, %7 : vector<4x32xf32>
    %cst = arith.constant dense<0.000000e+00> : vector<4x16xf32>
    %9 = tpu.matmul %8, %2, %cst {dimension_numbers = #tpu.dot_dimension_numbers<[1], [0], [0], [1], [0, 0, 1, 1], [], []>} : vector<4x32xf32>, vector<32x16xf32>, vector<4x16xf32> -> vector<4x16xf32>
    %cst_14 = arith.constant dense<0.000000e+00> : vector<4x16xf32>
    %10 = tpu.matmul %8, %3, %cst_14 {dimension_numbers = #tpu.dot_dimension_numbers<[1], [0], [0], [1], [0, 0, 1, 1], [], []>} : vector<4x32xf32>, vector<32x16xf32>, vector<4x16xf32> -> vector<4x16xf32>
    %11 = arith.maximumf %9, %10 : vector<4x16xf32>
    %c0_15 = arith.constant 0 : index
    %c0_16 = arith.constant 0 : index
    %c0_17 = arith.constant 0 : index
    %c0_18 = arith.constant 0 : index
    %12 = vector.load %arg3[%c0_15, %c0_16, %c0_17, %c0_18] : memref<1x4x8x16xf32, #tpu.memory_space<vmem>>, vector<1x4x1x16xf32>
    %13 = vector.shape_cast %12 : vector<1x4x1x16xf32> to vector<4x16xf32>
    %14 = arith.addf %11, %13 : vector<4x16xf32>
    %cst_19 = arith.constant dense<0.000000e+00> : vector<4x16xf32>
    %15 = tpu.matmul %0, %14, %cst_19 {dimension_numbers = #tpu.dot_dimension_numbers<[1], [0], [0], [1], [0, 0, 1, 1], [], []>} : vector<4x4xf32>, vector<4x16xf32>, vector<4x16xf32> -> vector<4x16xf32>
    %16 = vector.broadcast %1 : vector<4x1xf32> to vector<4x16xf32>
    %17 = arith.addf %15, %16 : vector<4x16xf32>
    %cst_20 = arith.constant 0.000000e+00 : f32
    %18 = vector.broadcast %cst_20 : f32 to vector<4x16xf32>
    %19 = arith.maximumf %17, %18 : vector<4x16xf32>
    %20 = arith.negf %19 : vector<4x16xf32>
    %21 = math.exp %20 : vector<4x16xf32>
    %cst_21 = arith.constant 1.000000e+00 : f32
    %22 = vector.broadcast %cst_21 : f32 to vector<4x16xf32>
    %23 = arith.addf %22, %21 : vector<4x16xf32>
    %24 = arith.divf %22, %23 : vector<4x16xf32>
    %cst_22 = arith.constant 1.000000e+00 : f32
    %25 = vector.broadcast %cst_22 : f32 to vector<4x16xf32>
    %26 = arith.addf %24, %25 : vector<4x16xf32>
    %27 = arith.mulf %13, %26 : vector<4x16xf32>
    %c0_23 = arith.constant 0 : index
    %c0_24 = arith.constant 0 : index
    %c0_25 = arith.constant 0 : index
    %c0_26 = arith.constant 0 : index
    %28 = vector.load %arg8[%c0_23, %c0_24, %c0_25, %c0_26] : memref<1x4x8x16xf32, #tpu.memory_space<vmem>>, vector<1x4x1x16xf32>
    %29 = vector.shape_cast %28 : vector<1x4x1x16xf32> to vector<4x16xf32>
    %30 = vector.shape_cast %27 : vector<4x16xf32> to vector<1x4x1x16xf32>
    tpu.vector_store %arg8[%c0_23, %c0_24, %c0_25, %c0_26], %30 {strides = array<i32>} : memref<1x4x8x16xf32, #tpu.memory_space<vmem>>, vector<1x4x1x16xf32>,
    %c0_27 = arith.constant 0 : index
    %c0_28 = arith.constant 0 : index
    %c2 = arith.constant 2 : index
    %c0_29 = arith.constant 0 : index
    %31 = vector.load %arg2[%c0_27, %c0_28, %c2, %c0_29] : memref<1x4x16x32xf32, #tpu.memory_space<vmem>>, vector<1x4x1x32xf32>
    %32 = vector.shape_cast %31 : vector<1x4x1x32xf32> to vector<4x32xf32>
    %c0_30 = arith.constant 0 : index
    %c0_31 = arith.constant 0 : index
    %c3 = arith.constant 3 : index
    %c0_32 = arith.constant 0 : index
    %33 = vector.load %arg2[%c0_30, %c0_31, %c3, %c0_32] : memref<1x4x16x32xf32, #tpu.memory_space<vmem>>, vector<1x4x1x32xf32>
    %34 = vector.shape_cast %33 : vector<1x4x1x32xf32> to vector<4x32xf32>
    %35 = arith.maximumf %32, %34 : vector<4x32xf32>
    %cst_33 = arith.constant dense<0.000000e+00> : vector<4x16xf32>
    %36 = tpu.matmul %35, %2, %cst_33 {dimension_numbers = #tpu.dot_dimension_numbers<[1], [0], [0], [1], [0, 0, 1, 1], [], []>} : vector<4x32xf32>, vector<32x16xf32>, vector<4x16xf32> -> vector<4x16xf32>
    %cst_34 = arith.constant dense<0.000000e+00> : vector<4x16xf32>
    %37 = tpu.matmul %35, %3, %cst_34 {dimension_numbers = #tpu.dot_dimension_numbers<[1], [0], [0], [1], [0, 0, 1, 1], [], []>} : vector<4x32xf32>, vector<32x16xf32>, vector<4x16xf32> -> vector<4x16xf32>
    %38 = arith.maximumf %36, %37 : vector<4x16xf32>
    %c0_35 = arith.constant 0 : index
    %c0_36 = arith.constant 0 : index
    %c1_37 = arith.constant 1 : index
    %c0_38 = arith.constant 0 : index
    %39 = vector.load %arg3[%c0_35, %c0_36, %c1_37, %c0_38] : memref<1x4x8x16xf32, #tpu.memory_space<vmem>>, vector<1x4x1x16xf32>
    %40 = vector.shape_cast %39 : vector<1x4x1x16xf32> to vector<4x16xf32>
    %41 = arith.addf %38, %40 : vector<4x16xf32>
    %cst_39 = arith.constant dense<0.000000e+00> : vector<4x16xf32>
    %42 = tpu.matmul %0, %41, %cst_39 {dimension_numbers = #tpu.dot_dimension_numbers<[1], [0], [0], [1], [0, 0, 1, 1], [], []>} : vector<4x4xf32>, vector<4x16xf32>, vector<4x16xf32> -> vector<4x16xf32>
    %43 = vector.broadcast %1 : vector<4x1xf32> to vector<4x16xf32>
    %44 = arith.addf %42, %43 : vector<4x16xf32>
    %cst_40 = arith.constant 0.000000e+00 : f32
    %45 = vector.broadcast %cst_40 : f32 to vector<4x16xf32>
    %46 = arith.maximumf %44, %45 : vector<4x16xf32>
    %47 = arith.negf %46 : vector<4x16xf32>
    %48 = math.exp %47 : vector<4x16xf32>
    %cst_41 = arith.constant 1.000000e+00 : f32
    %49 = vector.broadcast %cst_41 : f32 to vector<4x16xf32>
    %50 = arith.addf %49, %48 : vector<4x16xf32>
    %51 = arith.divf %49, %50 : vector<4x16xf32>
    %cst_42 = arith.constant 1.000000e+00 : f32
    %52 = vector.broadcast %cst_42 : f32 to vector<4x16xf32>
    %53 = arith.addf %51, %52 : vector<4x16xf32>
    %54 = arith.mulf %40, %53 : vector<4x16xf32>
    %c0_43 = arith.constant 0 : index
    %c0_44 = arith.constant 0 : index
    %c1_45 = arith.constant 1 : index
    %c0_46 = arith.constant 0 : index
    %55 = vector.load %arg8[%c0_43, %c0_44, %c1_45, %c0_46] : memref<1x4x8x16xf32, #tpu.memory_space<vmem>>, vector<1x4x1x16xf32>
    %56 = vector.shape_cast %55 : vector<1x4x1x16xf32> to vector<4x16xf32>
    %57 = vector.shape_cast %54 : vector<4x16xf32> to vector<1x4x1x16xf32>
    tpu.vector_store %arg8[%c0_43, %c0_44, %c1_45, %c0_46], %57 {strides = array<i32>} : memref<1x4x8x16xf32, #tpu.memory_space<vmem>>, vector<1x4x1x16xf32>,
    %c0_47 = arith.constant 0 : index
    %c0_48 = arith.constant 0 : index
    %c4 = arith.constant 4 : index
    %c0_49 = arith.constant 0 : index
    %58 = vector.load %arg2[%c0_47, %c0_48, %c4, %c0_49] : memref<1x4x16x32xf32, #tpu.memory_space<vmem>>, vector<1x4x1x32xf32>
    %59 = vector.shape_cast %58 : vector<1x4x1x32xf32> to vector<4x32xf32>
    %c0_50 = arith.constant 0 : index
    %c0_51 = arith.constant 0 : index
    %c5 = arith.constant 5 : index
    %c0_52 = arith.constant 0 : index
    %60 = vector.load %arg2[%c0_50, %c0_51, %c5, %c0_52] : memref<1x4x16x32xf32, #tpu.memory_space<vmem>>, vector<1x4x1x32xf32>
    %61 = vector.shape_cast %60 : vector<1x4x1x32xf32> to vector<4x32xf32>
    %62 = arith.maximumf %59, %61 : vector<4x32xf32>
    %cst_53 = arith.constant dense<0.000000e+00> : vector<4x16xf32>
    %63 = tpu.matmul %62, %2, %cst_53 {dimension_numbers = #tpu.dot_dimension_numbers<[1], [0], [0], [1], [0, 0, 1, 1], [], []>} : vector<4x32xf32>, vector<32x16xf32>, vector<4x16xf32> -> vector<4x16xf32>
    %cst_54 = arith.constant dense<0.000000e+00> : vector<4x16xf32>
    %64 = tpu.matmul %62, %3, %cst_54 {dimension_numbers = #tpu.dot_dimension_numbers<[1], [0], [0], [1], [0, 0, 1, 1], [], []>} : vector<4x32xf32>, vector<32x16xf32>, vector<4x16xf32> -> vector<4x16xf32>
    %65 = arith.maximumf %63, %64 : vector<4x16xf32>
    %c0_55 = arith.constant 0 : index
    %c0_56 = arith.constant 0 : index
    %c2_57 = arith.constant 2 : index
    %c0_58 = arith.constant 0 : index
    %66 = vector.load %arg3[%c0_55, %c0_56, %c2_57, %c0_58] : memref<1x4x8x16xf32, #tpu.memory_space<vmem>>, vector<1x4x1x16xf32>
    %67 = vector.shape_cast %66 : vector<1x4x1x16xf32> to vector<4x16xf32>
    %68 = arith.addf %65, %67 : vector<4x16xf32>
    %cst_59 = arith.constant dense<0.000000e+00> : vector<4x16xf32>
    %69 = tpu.matmul %0, %68, %cst_59 {dimension_numbers = #tpu.dot_dimension_numbers<[1], [0], [0], [1], [0, 0, 1, 1], [], []>} : vector<4x4xf32>, vector<4x16xf32>, vector<4x16xf32> -> vector<4x16xf32>
    %70 = vector.broadcast %1 : vector<4x1xf32> to vector<4x16xf32>
    %71 = arith.addf %69, %70 : vector<4x16xf32>
    %cst_60 = arith.constant 0.000000e+00 : f32
    %72 = vector.broadcast %cst_60 : f32 to vector<4x16xf32>
    %73 = arith.maximumf %71, %72 : vector<4x16xf32>
    %74 = arith.negf %73 : vector<4x16xf32>
    %75 = math.exp %74 : vector<4x16xf32>
    %cst_61 = arith.constant 1.000000e+00 : f32
    %76 = vector.broadcast %cst_61 : f32 to vector<4x16xf32>
    %77 = arith.addf %76, %75 : vector<4x16xf32>
    %78 = arith.divf %76, %77 : vector<4x16xf32>
    %cst_62 = arith.constant 1.000000e+00 : f32
    %79 = vector.broadcast %cst_62 : f32 to vector<4x16xf32>
    %80 = arith.addf %78, %79 : vector<4x16xf32>
    %81 = arith.mulf %67, %80 : vector<4x16xf32>
    %c0_63 = arith.constant 0 : index
    %c0_64 = arith.constant 0 : index
    %c2_65 = arith.constant 2 : index
    %c0_66 = arith.constant 0 : index
    %82 = vector.load %arg8[%c0_63, %c0_64, %c2_65, %c0_66] : memref<1x4x8x16xf32, #tpu.memory_space<vmem>>, vector<1x4x1x16xf32>
    %83 = vector.shape_cast %82 : vector<1x4x1x16xf32> to vector<4x16xf32>
    %84 = vector.shape_cast %81 : vector<4x16xf32> to vector<1x4x1x16xf32>
    tpu.vector_store %arg8[%c0_63, %c0_64, %c2_65, %c0_66], %84 {strides = array<i32>} : memref<1x4x8x16xf32, #tpu.memory_space<vmem>>, vector<1x4x1x16xf32>,
    %c0_67 = arith.constant 0 : index
    %c0_68 = arith.constant 0 : index
    %c6 = arith.constant 6 : index
    %c0_69 = arith.constant 0 : index
    %85 = vector.load %arg2[%c0_67, %c0_68, %c6, %c0_69] : memref<1x4x16x32xf32, #tpu.memory_space<vmem>>, vector<1x4x1x32xf32>
    %86 = vector.shape_cast %85 : vector<1x4x1x32xf32> to vector<4x32xf32>
    %c0_70 = arith.constant 0 : index
    %c0_71 = arith.constant 0 : index
    %c7 = arith.constant 7 : index
    %c0_72 = arith.constant 0 : index
    %87 = vector.load %arg2[%c0_70, %c0_71, %c7, %c0_72] : memref<1x4x16x32xf32, #tpu.memory_space<vmem>>, vector<1x4x1x32xf32>
    %88 = vector.shape_cast %87 : vector<1x4x1x32xf32> to vector<4x32xf32>
    %89 = arith.maximumf %86, %88 : vector<4x32xf32>
    %cst_73 = arith.constant dense<0.000000e+00> : vector<4x16xf32>
    %90 = tpu.matmul %89, %2, %cst_73 {dimension_numbers = #tpu.dot_dimension_numbers<[1], [0], [0], [1], [0, 0, 1, 1], [], []>} : vector<4x32xf32>, vector<32x16xf32>, vector<4x16xf32> -> vector<4x16xf32>
    %cst_74 = arith.constant dense<0.000000e+00> : vector<4x16xf32>
    %91 = tpu.matmul %89, %3, %cst_74 {dimension_numbers = #tpu.dot_dimension_numbers<[1], [0], [0], [1], [0, 0, 1, 1], [], []>} : vector<4x32xf32>, vector<32x16xf32>, vector<4x16xf32> -> vector<4x16xf32>
    %92 = arith.maximumf %90, %91 : vector<4x16xf32>
    %c0_75 = arith.constant 0 : index
    %c0_76 = arith.constant 0 : index
    %c3_77 = arith.constant 3 : index
    %c0_78 = arith.constant 0 : index
    %93 = vector.load %arg3[%c0_75, %c0_76, %c3_77, %c0_78] : memref<1x4x8x16xf32, #tpu.memory_space<vmem>>, vector<1x4x1x16xf32>
    %94 = vector.shape_cast %93 : vector<1x4x1x16xf32> to vector<4x16xf32>
    %95 = arith.addf %92, %94 : vector<4x16xf32>
    %cst_79 = arith.constant dense<0.000000e+00> : vector<4x16xf32>
    %96 = tpu.matmul %0, %95, %cst_79 {dimension_numbers = #tpu.dot_dimension_numbers<[1], [0], [0], [1], [0, 0, 1, 1], [], []>} : vector<4x4xf32>, vector<4x16xf32>, vector<4x16xf32> -> vector<4x16xf32>
    %97 = vector.broadcast %1 : vector<4x1xf32> to vector<4x16xf32>
    %98 = arith.addf %96, %97 : vector<4x16xf32>
    %cst_80 = arith.constant 0.000000e+00 : f32
    %99 = vector.broadcast %cst_80 : f32 to vector<4x16xf32>
    %100 = arith.maximumf %98, %99 : vector<4x16xf32>
    %101 = arith.negf %100 : vector<4x16xf32>
    %102 = math.exp %101 : vector<4x16xf32>
    %cst_81 = arith.constant 1.000000e+00 : f32
    %103 = vector.broadcast %cst_81 : f32 to vector<4x16xf32>
    %104 = arith.addf %103, %102 : vector<4x16xf32>
    %105 = arith.divf %103, %104 : vector<4x16xf32>
    %cst_82 = arith.constant 1.000000e+00 : f32
    %106 = vector.broadcast %cst_82 : f32 to vector<4x16xf32>
    %107 = arith.addf %105, %106 : vector<4x16xf32>
    %108 = arith.mulf %94, %107 : vector<4x16xf32>
    %c0_83 = arith.constant 0 : index
    %c0_84 = arith.constant 0 : index
    %c3_85 = arith.constant 3 : index
    %c0_86 = arith.constant 0 : index
    %109 = vector.load %arg8[%c0_83, %c0_84, %c3_85, %c0_86] : memref<1x4x8x16xf32, #tpu.memory_space<vmem>>, vector<1x4x1x16xf32>
    %110 = vector.shape_cast %109 : vector<1x4x1x16xf32> to vector<4x16xf32>
    %111 = vector.shape_cast %108 : vector<4x16xf32> to vector<1x4x1x16xf32>
    tpu.vector_store %arg8[%c0_83, %c0_84, %c3_85, %c0_86], %111 {strides = array<i32>} : memref<1x4x8x16xf32, #tpu.memory_space<vmem>>, vector<1x4x1x16xf32>,
    %c0_87 = arith.constant 0 : index
    %c0_88 = arith.constant 0 : index
    %c8 = arith.constant 8 : index
    %c0_89 = arith.constant 0 : index
    %112 = vector.load %arg2[%c0_87, %c0_88, %c8, %c0_89] : memref<1x4x16x32xf32, #tpu.memory_space<vmem>>, vector<1x4x1x32xf32>
    %113 = vector.shape_cast %112 : vector<1x4x1x32xf32> to vector<4x32xf32>
    %c0_90 = arith.constant 0 : index
    %c0_91 = arith.constant 0 : index
    %c9 = arith.constant 9 : index
    %c0_92 = arith.constant 0 : index
    %114 = vector.load %arg2[%c0_90, %c0_91, %c9, %c0_92] : memref<1x4x16x32xf32, #tpu.memory_space<vmem>>, vector<1x4x1x32xf32>
    %115 = vector.shape_cast %114 : vector<1x4x1x32xf32> to vector<4x32xf32>
    %116 = arith.maximumf %113, %115 : vector<4x32xf32>
    %cst_93 = arith.constant dense<0.000000e+00> : vector<4x16xf32>
    %117 = tpu.matmul %116, %2, %cst_93 {dimension_numbers = #tpu.dot_dimension_numbers<[1], [0], [0], [1], [0, 0, 1, 1], [], []>} : vector<4x32xf32>, vector<32x16xf32>, vector<4x16xf32> -> vector<4x16xf32>
    %cst_94 = arith.constant dense<0.000000e+00> : vector<4x16xf32>
    %118 = tpu.matmul %116, %3, %cst_94 {dimension_numbers = #tpu.dot_dimension_numbers<[1], [0], [0], [1], [0, 0, 1, 1], [], []>} : vector<4x32xf32>, vector<32x16xf32>, vector<4x16xf32> -> vector<4x16xf32>
    %119 = arith.maximumf %117, %118 : vector<4x16xf32>
    %c0_95 = arith.constant 0 : index
    %c0_96 = arith.constant 0 : index
    %c4_97 = arith.constant 4 : index
    %c0_98 = arith.constant 0 : index
    %120 = vector.load %arg3[%c0_95, %c0_96, %c4_97, %c0_98] : memref<1x4x8x16xf32, #tpu.memory_space<vmem>>, vector<1x4x1x16xf32>
    %121 = vector.shape_cast %120 : vector<1x4x1x16xf32> to vector<4x16xf32>
    %122 = arith.addf %119, %121 : vector<4x16xf32>
    %cst_99 = arith.constant dense<0.000000e+00> : vector<4x16xf32>
    %123 = tpu.matmul %0, %122, %cst_99 {dimension_numbers = #tpu.dot_dimension_numbers<[1], [0], [0], [1], [0, 0, 1, 1], [], []>} : vector<4x4xf32>, vector<4x16xf32>, vector<4x16xf32> -> vector<4x16xf32>
    %124 = vector.broadcast %1 : vector<4x1xf32> to vector<4x16xf32>
    %125 = arith.addf %123, %124 : vector<4x16xf32>
    %cst_100 = arith.constant 0.000000e+00 : f32
    %126 = vector.broadcast %cst_100 : f32 to vector<4x16xf32>
    %127 = arith.maximumf %125, %126 : vector<4x16xf32>
    %128 = arith.negf %127 : vector<4x16xf32>
    %129 = math.exp %128 : vector<4x16xf32>
    %cst_101 = arith.constant 1.000000e+00 : f32
    %130 = vector.broadcast %cst_101 : f32 to vector<4x16xf32>
    %131 = arith.addf %130, %129 : vector<4x16xf32>
    %132 = arith.divf %130, %131 : vector<4x16xf32>
    %cst_102 = arith.constant 1.000000e+00 : f32
    %133 = vector.broadcast %cst_102 : f32 to vector<4x16xf32>
    %134 = arith.addf %132, %133 : vector<4x16xf32>
    %135 = arith.mulf %121, %134 : vector<4x16xf32>
    %c0_103 = arith.constant 0 : index
    %c0_104 = arith.constant 0 : index
    %c4_105 = arith.constant 4 : index
    %c0_106 = arith.constant 0 : index
    %136 = vector.load %arg8[%c0_103, %c0_104, %c4_105, %c0_106] : memref<1x4x8x16xf32, #tpu.memory_space<vmem>>, vector<1x4x1x16xf32>
    %137 = vector.shape_cast %136 : vector<1x4x1x16xf32> to vector<4x16xf32>
    %138 = vector.shape_cast %135 : vector<4x16xf32> to vector<1x4x1x16xf32>
    tpu.vector_store %arg8[%c0_103, %c0_104, %c4_105, %c0_106], %138 {strides = array<i32>} : memref<1x4x8x16xf32, #tpu.memory_space<vmem>>, vector<1x4x1x16xf32>,
    %c0_107 = arith.constant 0 : index
    %c0_108 = arith.constant 0 : index
    %c10 = arith.constant 10 : index
    %c0_109 = arith.constant 0 : index
    %139 = vector.load %arg2[%c0_107, %c0_108, %c10, %c0_109] : memref<1x4x16x32xf32, #tpu.memory_space<vmem>>, vector<1x4x1x32xf32>
    %140 = vector.shape_cast %139 : vector<1x4x1x32xf32> to vector<4x32xf32>
    %c0_110 = arith.constant 0 : index
    %c0_111 = arith.constant 0 : index
    %c11 = arith.constant 11 : index
    %c0_112 = arith.constant 0 : index
    %141 = vector.load %arg2[%c0_110, %c0_111, %c11, %c0_112] : memref<1x4x16x32xf32, #tpu.memory_space<vmem>>, vector<1x4x1x32xf32>
    %142 = vector.shape_cast %141 : vector<1x4x1x32xf32> to vector<4x32xf32>
    %143 = arith.maximumf %140, %142 : vector<4x32xf32>
    %cst_113 = arith.constant dense<0.000000e+00> : vector<4x16xf32>
    %144 = tpu.matmul %143, %2, %cst_113 {dimension_numbers = #tpu.dot_dimension_numbers<[1], [0], [0], [1], [0, 0, 1, 1], [], []>} : vector<4x32xf32>, vector<32x16xf32>, vector<4x16xf32> -> vector<4x16xf32>
    %cst_114 = arith.constant dense<0.000000e+00> : vector<4x16xf32>
    %145 = tpu.matmul %143, %3, %cst_114 {dimension_numbers = #tpu.dot_dimension_numbers<[1], [0], [0], [1], [0, 0, 1, 1], [], []>} : vector<4x32xf32>, vector<32x16xf32>, vector<4x16xf32> -> vector<4x16xf32>
    %146 = arith.maximumf %144, %145 : vector<4x16xf32>
    %c0_115 = arith.constant 0 : index
    %c0_116 = arith.constant 0 : index
    %c5_117 = arith.constant 5 : index
    %c0_118 = arith.constant 0 : index
    %147 = vector.load %arg3[%c0_115, %c0_116, %c5_117, %c0_118] : memref<1x4x8x16xf32, #tpu.memory_space<vmem>>, vector<1x4x1x16xf32>
    %148 = vector.shape_cast %147 : vector<1x4x1x16xf32> to vector<4x16xf32>
    %149 = arith.addf %146, %148 : vector<4x16xf32>
    %cst_119 = arith.constant dense<0.000000e+00> : vector<4x16xf32>
    %150 = tpu.matmul %0, %149, %cst_119 {dimension_numbers = #tpu.dot_dimension_numbers<[1], [0], [0], [1], [0, 0, 1, 1], [], []>} : vector<4x4xf32>, vector<4x16xf32>, vector<4x16xf32> -> vector<4x16xf32>
    %151 = vector.broadcast %1 : vector<4x1xf32> to vector<4x16xf32>
    %152 = arith.addf %150, %151 : vector<4x16xf32>
    %cst_120 = arith.constant 0.000000e+00 : f32
    %153 = vector.broadcast %cst_120 : f32 to vector<4x16xf32>
    %154 = arith.maximumf %152, %153 : vector<4x16xf32>
    %155 = arith.negf %154 : vector<4x16xf32>
    %156 = math.exp %155 : vector<4x16xf32>
    %cst_121 = arith.constant 1.000000e+00 : f32
    %157 = vector.broadcast %cst_121 : f32 to vector<4x16xf32>
    %158 = arith.addf %157, %156 : vector<4x16xf32>
    %159 = arith.divf %157, %158 : vector<4x16xf32>
    %cst_122 = arith.constant 1.000000e+00 : f32
    %160 = vector.broadcast %cst_122 : f32 to vector<4x16xf32>
    %161 = arith.addf %159, %160 : vector<4x16xf32>
    %162 = arith.mulf %148, %161 : vector<4x16xf32>
    %c0_123 = arith.constant 0 : index
    %c0_124 = arith.constant 0 : index
    %c5_125 = arith.constant 5 : index
    %c0_126 = arith.constant 0 : index
    %163 = vector.load %arg8[%c0_123, %c0_124, %c5_125, %c0_126] : memref<1x4x8x16xf32, #tpu.memory_space<vmem>>, vector<1x4x1x16xf32>
    %164 = vector.shape_cast %163 : vector<1x4x1x16xf32> to vector<4x16xf32>
    %165 = vector.shape_cast %162 : vector<4x16xf32> to vector<1x4x1x16xf32>
    tpu.vector_store %arg8[%c0_123, %c0_124, %c5_125, %c0_126], %165 {strides = array<i32>} : memref<1x4x8x16xf32, #tpu.memory_space<vmem>>, vector<1x4x1x16xf32>,
    %c0_127 = arith.constant 0 : index
    %c0_128 = arith.constant 0 : index
    %c12 = arith.constant 12 : index
    %c0_129 = arith.constant 0 : index
    %166 = vector.load %arg2[%c0_127, %c0_128, %c12, %c0_129] : memref<1x4x16x32xf32, #tpu.memory_space<vmem>>, vector<1x4x1x32xf32>
    %167 = vector.shape_cast %166 : vector<1x4x1x32xf32> to vector<4x32xf32>
    %c0_130 = arith.constant 0 : index
    %c0_131 = arith.constant 0 : index
    %c13 = arith.constant 13 : index
    %c0_132 = arith.constant 0 : index
    %168 = vector.load %arg2[%c0_130, %c0_131, %c13, %c0_132] : memref<1x4x16x32xf32, #tpu.memory_space<vmem>>, vector<1x4x1x32xf32>
    %169 = vector.shape_cast %168 : vector<1x4x1x32xf32> to vector<4x32xf32>
    %170 = arith.maximumf %167, %169 : vector<4x32xf32>
    %cst_133 = arith.constant dense<0.000000e+00> : vector<4x16xf32>
    %171 = tpu.matmul %170, %2, %cst_133 {dimension_numbers = #tpu.dot_dimension_numbers<[1], [0], [0], [1], [0, 0, 1, 1], [], []>} : vector<4x32xf32>, vector<32x16xf32>, vector<4x16xf32> -> vector<4x16xf32>
    %cst_134 = arith.constant dense<0.000000e+00> : vector<4x16xf32>
    %172 = tpu.matmul %170, %3, %cst_134 {dimension_numbers = #tpu.dot_dimension_numbers<[1], [0], [0], [1], [0, 0, 1, 1], [], []>} : vector<4x32xf32>, vector<32x16xf32>, vector<4x16xf32> -> vector<4x16xf32>
    %173 = arith.maximumf %171, %172 : vector<4x16xf32>
    %c0_135 = arith.constant 0 : index
    %c0_136 = arith.constant 0 : index
    %c6_137 = arith.constant 6 : index
    %c0_138 = arith.constant 0 : index
    %174 = vector.load %arg3[%c0_135, %c0_136, %c6_137, %c0_138] : memref<1x4x8x16xf32, #tpu.memory_space<vmem>>, vector<1x4x1x16xf32>
    %175 = vector.shape_cast %174 : vector<1x4x1x16xf32> to vector<4x16xf32>
    %176 = arith.addf %173, %175 : vector<4x16xf32>
    %cst_139 = arith.constant dense<0.000000e+00> : vector<4x16xf32>
    %177 = tpu.matmul %0, %176, %cst_139 {dimension_numbers = #tpu.dot_dimension_numbers<[1], [0], [0], [1], [0, 0, 1, 1], [], []>} : vector<4x4xf32>, vector<4x16xf32>, vector<4x16xf32> -> vector<4x16xf32>
    %178 = vector.broadcast %1 : vector<4x1xf32> to vector<4x16xf32>
    %179 = arith.addf %177, %178 : vector<4x16xf32>
    %cst_140 = arith.constant 0.000000e+00 : f32
    %180 = vector.broadcast %cst_140 : f32 to vector<4x16xf32>
    %181 = arith.maximumf %179, %180 : vector<4x16xf32>
    %182 = arith.negf %181 : vector<4x16xf32>
    %183 = math.exp %182 : vector<4x16xf32>
    %cst_141 = arith.constant 1.000000e+00 : f32
    %184 = vector.broadcast %cst_141 : f32 to vector<4x16xf32>
    %185 = arith.addf %184, %183 : vector<4x16xf32>
    %186 = arith.divf %184, %185 : vector<4x16xf32>
    %cst_142 = arith.constant 1.000000e+00 : f32
    %187 = vector.broadcast %cst_142 : f32 to vector<4x16xf32>
    %188 = arith.addf %186, %187 : vector<4x16xf32>
    %189 = arith.mulf %175, %188 : vector<4x16xf32>
    %c0_143 = arith.constant 0 : index
    %c0_144 = arith.constant 0 : index
    %c6_145 = arith.constant 6 : index
    %c0_146 = arith.constant 0 : index
    %190 = vector.load %arg8[%c0_143, %c0_144, %c6_145, %c0_146] : memref<1x4x8x16xf32, #tpu.memory_space<vmem>>, vector<1x4x1x16xf32>
    %191 = vector.shape_cast %190 : vector<1x4x1x16xf32> to vector<4x16xf32>
    %192 = vector.shape_cast %189 : vector<4x16xf32> to vector<1x4x1x16xf32>
    tpu.vector_store %arg8[%c0_143, %c0_144, %c6_145, %c0_146], %192 {strides = array<i32>} : memref<1x4x8x16xf32, #tpu.memory_space<vmem>>, vector<1x4x1x16xf32>,
    %c0_147 = arith.constant 0 : index
    %c0_148 = arith.constant 0 : index
    %c14 = arith.constant 14 : index
    %c0_149 = arith.constant 0 : index
    %193 = vector.load %arg2[%c0_147, %c0_148, %c14, %c0_149] : memref<1x4x16x32xf32, #tpu.memory_space<vmem>>, vector<1x4x1x32xf32>
    %194 = vector.shape_cast %193 : vector<1x4x1x32xf32> to vector<4x32xf32>
    %c0_150 = arith.constant 0 : index
    %c0_151 = arith.constant 0 : index
    %c15 = arith.constant 15 : index
    %c0_152 = arith.constant 0 : index
    %195 = vector.load %arg2[%c0_150, %c0_151, %c15, %c0_152] : memref<1x4x16x32xf32, #tpu.memory_space<vmem>>, vector<1x4x1x32xf32>
    %196 = vector.shape_cast %195 : vector<1x4x1x32xf32> to vector<4x32xf32>
    %197 = arith.maximumf %194, %196 : vector<4x32xf32>
    %cst_153 = arith.constant dense<0.000000e+00> : vector<4x16xf32>
    %198 = tpu.matmul %197, %2, %cst_153 {dimension_numbers = #tpu.dot_dimension_numbers<[1], [0], [0], [1], [0, 0, 1, 1], [], []>} : vector<4x32xf32>, vector<32x16xf32>, vector<4x16xf32> -> vector<4x16xf32>
    %cst_154 = arith.constant dense<0.000000e+00> : vector<4x16xf32>
    %199 = tpu.matmul %197, %3, %cst_154 {dimension_numbers = #tpu.dot_dimension_numbers<[1], [0], [0], [1], [0, 0, 1, 1], [], []>} : vector<4x32xf32>, vector<32x16xf32>, vector<4x16xf32> -> vector<4x16xf32>
    %200 = arith.maximumf %198, %199 : vector<4x16xf32>
    %c0_155 = arith.constant 0 : index
    %c0_156 = arith.constant 0 : index
    %c7_157 = arith.constant 7 : index
    %c0_158 = arith.constant 0 : index
    %201 = vector.load %arg3[%c0_155, %c0_156, %c7_157, %c0_158] : memref<1x4x8x16xf32, #tpu.memory_space<vmem>>, vector<1x4x1x16xf32>
    %202 = vector.shape_cast %201 : vector<1x4x1x16xf32> to vector<4x16xf32>
    %203 = arith.addf %200, %202 : vector<4x16xf32>
    %cst_159 = arith.constant dense<0.000000e+00> : vector<4x16xf32>
    %204 = tpu.matmul %0, %203, %cst_159 {dimension_numbers = #tpu.dot_dimension_numbers<[1], [0], [0], [1], [0, 0, 1, 1], [], []>} : vector<4x4xf32>, vector<4x16xf32>, vector<4x16xf32> -> vector<4x16xf32>
    %205 = vector.broadcast %1 : vector<4x1xf32> to vector<4x16xf32>
    %206 = arith.addf %204, %205 : vector<4x16xf32>
    %cst_160 = arith.constant 0.000000e+00 : f32
    %207 = vector.broadcast %cst_160 : f32 to vector<4x16xf32>
    %208 = arith.maximumf %206, %207 : vector<4x16xf32>
    %209 = arith.negf %208 : vector<4x16xf32>
    %210 = math.exp %209 : vector<4x16xf32>
    %cst_161 = arith.constant 1.000000e+00 : f32
    %211 = vector.broadcast %cst_161 : f32 to vector<4x16xf32>
    %212 = arith.addf %211, %210 : vector<4x16xf32>
    %213 = arith.divf %211, %212 : vector<4x16xf32>
    %cst_162 = arith.constant 1.000000e+00 : f32
    %214 = vector.broadcast %cst_162 : f32 to vector<4x16xf32>
    %215 = arith.addf %213, %214 : vector<4x16xf32>
    %216 = arith.mulf %202, %215 : vector<4x16xf32>
    %c0_163 = arith.constant 0 : index
    %c0_164 = arith.constant 0 : index
    %c7_165 = arith.constant 7 : index
    %c0_166 = arith.constant 0 : index
    %217 = vector.load %arg8[%c0_163, %c0_164, %c7_165, %c0_166] : memref<1x4x8x16xf32, #tpu.memory_space<vmem>>, vector<1x4x1x16xf32>
    %218 = vector.shape_cast %217 : vector<1x4x1x16xf32> to vector<4x16xf32>
    %219 = vector.shape_cast %216 : vector<4x16xf32> to vector<1x4x1x16xf32>
    tpu.vector_store %arg8[%c0_163, %c0_164, %c7_165, %c0_166], %219 {strides = array<i32>} : memref<1x4x8x16xf32, #tpu.memory_space<vmem>>, vector<1x4x1x16xf32>,
    return
  }
  func.func @transform_0(%arg0: i32, %arg1: i32) -> (i32, i32, i32, i32) {
    %c0_i32 = arith.constant 0 : i32
    %c0_i32_0 = arith.constant 0 : i32
    %c0_i32_1 = arith.constant 0 : i32
    return %arg0, %c0_i32, %arg1, %c0_i32_0 : i32, i32, i32, i32
  }
  func.func @transform_1(%arg0: i32, %arg1: i32) -> (i32, i32, i32, i32) {
    %c0_i32 = arith.constant 0 : i32
    %c0_i32_0 = arith.constant 0 : i32
    %c0_i32_1 = arith.constant 0 : i32
    return %arg0, %c0_i32, %arg1, %c0_i32_0 : i32, i32, i32, i32
  }
  func.func @transform_2(%arg0: i32, %arg1: i32) -> (i32, i32) {
    %c0_i32 = arith.constant 0 : i32
    %c0_i32_0 = arith.constant 0 : i32
    %c0_i32_1 = arith.constant 0 : i32
    return %c0_i32, %c0_i32_0 : i32, i32
  }
  func.func @transform_3(%arg0: i32, %arg1: i32) -> (i32, i32) {
    %c0_i32 = arith.constant 0 : i32
    %c0_i32_0 = arith.constant 0 : i32
    %c0_i32_1 = arith.constant 0 : i32
    return %c0_i32, %c0_i32_0 : i32, i32
  }
  func.func @transform_4(%arg0: i32, %arg1: i32) -> (i32, i32) {
    %c0_i32 = arith.constant 0 : i32
    %c0_i32_0 = arith.constant 0 : i32
    %c0_i32_1 = arith.constant 0 : i32
    return %c0_i32, %c0_i32_0 : i32, i32
  }
  func.func @transform_5(%arg0: i32, %arg1: i32) -> (i32, i32) {
    %c0_i32 = arith.constant 0 : i32
    %c0_i32_0 = arith.constant 0 : i32
    %c0_i32_1 = arith.constant 0 : i32
    return %c0_i32, %c0_i32_0 : i32, i32
  }
  func.func @transform_6(%arg0: i32, %arg1: i32) -> (i32, i32, i32, i32) {
    %c0_i32 = arith.constant 0 : i32
    %c0_i32_0 = arith.constant 0 : i32
    %c0_i32_1 = arith.constant 0 : i32
    return %arg0, %c0_i32, %arg1, %c0_i32_0 : i32, i32, i32, i32
  }
}

</mosaic_0001>

<bundles_post_ra>
// kernel: tpu_custom_call.1
= control target key start
LH: loop header
LB: loop body
LE: loop exit
PB: predicated region body
PF: predicated region fallthrough
CT: control target
= control target key end

     0   :  { %s4240_s0 = inlined_call_operand.hbm [shape: f32[2,4,32,32], index: 0, kind: input, shape index: {}]   ;;  %s4241_s1 = inlined_call_operand.hbm [shape: f32[2,4,16,16], index: 1, kind: input, shape index: {}]   ;;  %s4242_s2 = inlined_call_operand.vmem [shape: f32[32,16], index: 2, kind: input, shape index: {}]   ;;  %s4243_s3 = inlined_call_operand.vmem [shape: f32[32,16], index: 3, kind: input, shape index: {}]   ;;  %s4244_s4 = inlined_call_operand.vmem [shape: f32[4,4], index: 4, kind: input, shape index: {}]   ;;  %s4245_s5 = inlined_call_operand.vmem [shape: f32[4,1], index: 5, kind: input, shape index: {}]   ;;  %s4246_s6 = inlined_call_operand.hbm [shape: f32[2,4,16,16], index: 6, kind: output, shape index: {}]  }
   0x1   :  { %4253 = sst [smem:[#allocation20_spill]] %s4240_s0 }
   0x2   :  { %4254 = sst [smem:[#allocation21_spill]] %s4246_s6 }
   0x3   :  { %11 = vsyncpa [#allocation3], 0 }
   0x4   :  { %13 = vsyncpa [#allocation3 + $0x1], 0 }
   0x5   :  { %14 = vsyncpa [#allocation6], 0 }
   0x6   :  { %16 = vsyncpa [#allocation6 + $0x1], 0 }
   0x7   :  { %17 = vsyncpa [#allocation4], 0 }
   0x8   :  { %19 = vsyncpa [#allocation4 + $0x1], 0  ;;  %s3424_s21 = smov 0   ;;  %s3426_s22 = smov 0  }
   0x9   :  { %s3428_s23 = smov 0   ;;  %s3430_s24 = smov 0  }
   0xa   :  { %s3432_s25 = smov 0   ;;  %s3434_s26 = smov 0  }
   0xb   :  { %s3436_s27 = smov 0   ;;  %s3438_s28 = smov 0  }
   0xc LB: > { %4255 = sst [smem:[#allocation14_spill]] %s3342_s21  ;;  %s2735_s29 = sadd.s32 4294967295, %s3370_s28   ;;  %s3370_s28 = sphi %s3438_s28, %s25_s28   ;;  %s3366_s27 = sphi %s3436_s27, %s4278_s27   ;;  %s3362_s26 = sphi %s3434_s26, %s4277_s26   ;;  %s3358_s25 = sphi %s3432_s25, %s4276_s25   ;;  %s3354_s24 = sphi %s3430_s24, %s4275_s24   ;;  %s3350_s23 = sphi %s3428_s23, %s4270_s23   ;;  %s3346_s22 = sphi %s3426_s22, %s4274_s22   ;;  %s3342_s21 = sphi %s3424_s21, %s4273_s21  }
   0xd   : > { %4256 = sst [smem:[#allocation15_spill]] %s3350_s23  ;;  %s2736_s30 = sadd.s32 4294967294, %s3370_s28  }
   0xe   : > { %s34_s7 = sadd.s32 1, %s3362_s26  ;;  %s37_s8 = sadd.s32 1, %s3366_s27 }
   0xf   : > { %p35_p0 = scmp.ge.s32.totalorder %s34_s7, 2  ;;  %p53_p1 = scmp.ne.s32.totalorder %s3350_s23, %s3346_s22 }
  0x10   : > { %p54_p2 = scmp.eq.s32.totalorder %s3370_s28, 0  ;;  %p59_p5 = scmp.ne.s32.totalorder %s3346_s22, %s3342_s21 }
  0x11   : > { %s4280_s7 = smov (%p35_p0, %s34_s7), 0  ;;  %s4282_s8 = smov (!%p35_p0, %s37_s8), %s3366_s27 }
  0x12   : > { %4257 = sst [smem:[#allocation16_spill]] %s4280_s7  ;;  %s42_s9 = ssub.s32 %s3362_s26, %s4280_s7 }
  0x13   : > { %p3476_p3 = por %p54_p2, %p53_p1  ;;  %p39_p4 = scmp.ge.s32.totalorder %s4282_s8, 2 }
  0x14   : > { %p60_p6 = scmp.eq.s32.totalorder %s2735_s29, 0  ;;  %p197_p7 = scmp.eq.s32.totalorder %s2735_s29, 3 }
  0x15   : > { %s4284_s8 = smov (%p39_p4, %s4282_s8), 0  ;;  %p203_p10 = scmp.eq.s32.totalorder %s2736_s30, 3 }
  0x16   : > { %4259 = sst [smem:[#allocation17_spill]] %s4284_s8  ;;  %p3484_p8 = por %p60_p6, %p59_p5 }
  0x17   : > { %p3488_p9 = por %p197_p7, %p53_p1  ;;  %s41_s13 = ssub.s32 %s3366_s27, %s4284_s8 }
  0x18   : > { %s43_s14 = sor.u32 %s42_s9, %s41_s13  ;;  %s46_s15 = sadd.s32 1, %s3350_s23 }
  0x19   : > { %p44_p11 = scmp.eq.s32.totalorder %s43_s14, 0  ;;  %p3495_p12 = por %p203_p10, %p59_p5 }
  0x1a   : > { %p2738_p13 = scmp.ge.s32.totalorder %s3370_s28, 4 }
  0x1b   : > { %s4262_s16 = scalar_select %p3495_p12, 1, 0 }
  0x1c   : > { %s3500_s17 = scalar_select %p44_p11, %s3350_s23, %s46_s15  }
  0x1d   : > { %4263 = sst [smem:[#allocation18_spill]] %s4262_s16  ;;  %231 = sbr.rel (%p2738_p13) target bundleno = 67 (0x43), region = 32 }
  0x1e   : > { %4264 = sst [smem:[#allocation19_spill]] %s3500_s17 }
  0x22   : > { %s3504_s18 = sand.u32 1, %s3350_s23   ;;  %s2740_s19 = sshll.u32 %s3362_s26, 1 }
  0x23   : > { %s2739_s20 = sshll.u32 %s3504_s18, 6  ;;  %s2741_s29 = sshll.u32 %s3366_s27, 4 }
  0x24   : > { %s245_s30 = sadd.s32 %s2741_s29, %s2740_s19  ;;  %s239_s9 = scalar_lea.vmem [#allocation2], %s2739_s20 }
  0x25   : > { %s260_s13 = sshll.u32 %s239_s9, 4  ;;  %s2742_s14 = sshll.u32 %s245_s30, 7  ;;  %s261_s13 = int_to_ptr.vmem [resolvable:$true] %s260_s13 }
  0x26   : > { %s3109_s15 = scalar_select %p3476_p3, [#allocation0], [#allocation10] }
  0x27   : > { %s3372_s8 = smov 512   ;;  %s3373_s17 = smov 256  }
  0x28   : > { %3110 = sst [smem:[#allocation9]] (%p3476_p3), %s3372_s8  ;;  %s3374_s23 = smov 2  }
  0x29   : > { %s252_s7 = sld [smem:[%s3109_s15]]   ;;  %s3375_s19 = smov 128  }
  0x2a   : > { %3111 = sst [smem:[#allocation9 + $0x1]] (%p3476_p3), %s3373_s17  ;;  %s3376_s9 = smov 8  }
  0x2b   : > { %3112 = sst [smem:[#allocation9 + $0x2]] (%p3476_p3), %s3374_s23  ;;  %s236_s16 = scalar_lea.sflag [#allocation3], %s3504_s18 }
  0x2c   : > { %3113 = sst [smem:[#allocation9 + $0x3]] (%p3476_p3), %s3375_s19  ;;  %s3377_s17 = smov 131072  }
  0x2d   : > { %s4265_s0 = sld [smem:[#allocation20_spill]]  ;;  %s2745_s23 = sshll.u32 %s3504_s18, 5 }
  0x2e   : > { %3114 = sst [smem:[#allocation9 + $0x4]] (%p3476_p3), %s3375_s19  ;;  %s2746_s21 = sshll.u32 %s3366_s27, 3 }
  0x2f   : > { %3115 = sst [smem:[#allocation9 + $0x5]] (%p3476_p3), %s3376_s9  ;;  %s2743_s8 = sshll.u32 %s252_s7, 26 }
  0x30   : > { %s2744_s15 = sadd.s32 134217728, %s2743_s8  ;;  %s292_s20 = sadd.s32 %s3362_s26, %s2746_s21 }
  0x31   : > { %s2747_s19 = sshll.u32 %s292_s20, 7  ;;  %s284_s8 = scalar_lea.sflag [#allocation6], %s3504_s18 }
  0x32   : > { %s294_s7 = scalar_lea.hbm %s4241_s1, %s2747_s19 }
  0x33   : > { %s247_s30 = scalar_lea.hbm %s4265_s0, %s2742_s14  ;;  %s287_s14 = scalar_lea.vmem [#allocation5], %s2745_s23 }
  0x34   : > { %3116 = dma.general (%p3476_p3), %s247_s30, 1024, %s261_s13, %s236_s16, %s3377_s17, [#allocation9], %s2744_s15, 0  }
  0x35   : > { %s295_s29 = sshll.u32 %s287_s14, 4  ;;  %s3378_s16 = smov [#allocation5]   ;;  %s296_s29 = int_to_ptr.vmem [resolvable:$true] %s295_s29 }
  0x36   : > { %s3256_s6 = scalar_lea.vmem %s296_s29, 512  ;;  %s3260_s13 = sshll.u32 %s3378_s16, 4  ;;  %s3261_s13 = int_to_ptr.vmem [resolvable:$false] %s3260_s13 }
  0x37   : > { %p3257_p0 = scmp.ne.s32.totalorder %s296_s29, %s3256_s6  ;;  %s3262_s30 = scalar_lea.vmem %s3261_s13, 1024 }
  0x38   : > { %p3263_p4 = scmp.lt.s32.totalorder %s296_s29, %s3261_s13  ;;  %p3264_p5 = scmp.lt.s32.totalorder %s3262_s30, %s3256_s6 }
  0x39   : > { %p3258_p1 = pnand %p3257_p0, %p3476_p3 }
  0x3a   : > { %p3265_p6 = por %p3264_p5, %p3263_p4 }
  0x3b   : > { %p3259_p2 = pneg %p3258_p1 }
  0x3d   : > { %p3266_p7 = pnand %p3265_p6, %p3259_p2 }
  0x3f   : > { %3269 = shalt.err (!%p3266_p7)
}
  0x40   : > { %s3379_s21 = smov 256   ;;  %s3380_s15 = smov 128  }
  0x41   : > { %s3381_s0 = smov 8  }
  0x42   : > { %3117 = dma.hbm_to_vmem [thread:$0]  (%p3476_p3), %s294_s7, 512, %s296_s29, %s284_s8, %s3379_s21, %s3380_s15, %s3381_s0  }
  0x43 PF: > { %p2748_p10 = scmp.ge.s32.totalorder %s3370_s28, 1  ;;  %p303_p11 = scmp.lt.s32.totalorder %s3370_s28, 5 }
  0x45   : > { %p304_p13 = pnand %p2748_p10, %p303_p11 }
  0x46   : > { %s3543_s18 = sand.u32 (!%p304_p13), 1, %s3346_s22  }
  0x47   : > { %307 = sbr.rel (%p304_p13) target bundleno = 1983 (0x7bf), region = 44  ;;  %s2749_s6 = sshll.u32 (!%p304_p13), %s3543_s18, 6 }
  0x48   : > { %s310_s17 = scalar_lea.sflag (!%p304_p13), [#allocation3], %s3543_s18  ;;  %s3547_s23 = scalar_lea.vmem (!%p304_p13), [#allocation2], %s2749_s6 }
  0x4c   : > { %3329 = dma.done.wait (%p3484_p8), %s310_s17, 1024  }
  0x4d   : > { %3331 = vsyncadd (%p3484_p8), %s310_s17, 4294966272  ;;  %s2750_s10 = sshll.u32 %s3543_s18, 5  ;;  %s319_s20 = scalar_lea.sflag [#allocation6], %s3543_s18 }
  0x4e   : > { %s3557_s14 = scalar_lea.vmem [#allocation5], %s2750_s10 }
  0x4f   : > { %3333 = dma.done.wait (%p3484_p8), %s319_s20, 512  }
  0x50   : > { %3335 = vsyncadd (%p3484_p8), %s319_s20, 4294966784  ;;  %v3382_v0 = vmov 0.0   ;;  %vm3383_vm0 = vmmov 0   ;;  %v3572_v1 = vld [vmem:[%s4242_s2 + $0x18] sm:$0xff]  ;;  %v3582_v3 = vld [vmem:[%s4242_s2 + $0x10] sm:$0xff]  ;;  %vm384_vm1 = vcmask 1041409  }
  0x51   : > { %2893 = vmatprep.subr.mxu0 %v3382_v0  ;;  %2904 = vmatprep.subr.mxu1 %v3382_v0  ;;  %v3577_v2 = vld [vmem:[%s4243_s3 + $0x18] sm:$0xff]  ;;  %v3589_v4 = vld [vmem:[%s4243_s3 + $0x10] sm:$0xff]  ;;  %v3594_v5 = vld [vmem:[%s4242_s2 + $0x8] sm:$0xff]  ;;  %vm387_vm2 = vcmask 1042434   ;;  %vm390_vm3 = vcmask 1043459   ;;  %vm392_vm4 = vcmask 261120  }
  0x52   : > { %2901 = vmatprep.mubr.msk.f32.mxu0 %vm3383_vm0, %v3382_v0  ;;  %2912 = vmatprep.mubr.msk.f32.mxu1 %vm3383_vm0, %v3382_v0  ;;  %v3599_v6 = vld [vmem:[%s4243_s3 + $0x8] sm:$0xff]  ;;  %v3606_v7 = vld [vmem:[%s4242_s2] sm:$0xff]  ;;  %v368_v10 = vld [vmem:[%s3547_s23 + $0x10] sm:$0x1]  ;;  %v3384_v46 = vmov 0   ;;  %vm561_vm5 = vcmask 1043456  }
  0x53   : > { %2894 = vmatpush3.msra.mxu0 %v3572_v1  ;;  %2905 = vmatpush3.msra.mxu1 %v3577_v2  ;;  %v3611_v8 = vld [vmem:[%s4243_s3] sm:$0xff]  ;;  %v370_v12 = vld [vmem:[%s3547_s23 + $0x30] sm:$0x1]  ;;  %v372_v14 = vld [vmem:[%s3547_s23 + $0x11] sm:$0x1]  ;;  %vm557_vm6 = vcmask 31744  }
  0x54   : > { %2895 = vmatprep.subr.mxu0 %v3382_v0  ;;  %2906 = vmatprep.subr.mxu1 %v3382_v0  ;;  %v367_v9 = vld [vmem:[%s3547_s23] sm:$0x1]  ;;  %v371_v13 = vld [vmem:[%s3547_s23 + $0x1] sm:$0x1]  ;;  %v374_v16 = vld [vmem:[%s3547_s23 + $0x31] sm:$0x1]  ;;  %v376_v18 = vmax.f32 %v368_v10, %v372_v14 }
  0x55   : > { %2896 = vmatpush3.msra.mxu0 %v3582_v3  ;;  %2907 = vmatpush3.msra.mxu1 %v3589_v4  ;;  %v369_v11 = vld [vmem:[%s3547_s23 + $0x20] sm:$0x1]  ;;  %v373_v15 = vld [vmem:[%s3547_s23 + $0x21] sm:$0x1]  ;;  %v375_v17 = vmax.f32 %v367_v9, %v371_v13  ;;  %v378_v20 = vmax.f32 %v370_v12, %v374_v16  ;;  %v661_v27 = vld [vmem:[%s3547_s23 + $0x12] sm:$0x1] }
  0x56   : > { %2897 = vmatprep.subr.mxu0 %v3382_v0  ;;  %2908 = vmatprep.subr.mxu1 %v3382_v0  ;;  %v377_v19 = vmax.f32 %v369_v11, %v373_v15  ;;  %v383_v21 = vrot.slane %v376_v18, 7  ;;  %v665_v28 = vld [vmem:[%s3547_s23 + $0x13] sm:$0x1]  ;;  %v662_v29 = vld [vmem:[%s3547_s23 + $0x22] sm:$0x1]  ;;  %vm655_vm7 = vcmask 122880  }
  0x57   : > { %2898 = vmatpush3.msra.mxu0 %v3594_v5  ;;  %2909 = vmatpush3.msra.mxu1 %v3599_v6  ;;  %v389_v23 = vrot.slane %v378_v20, 5  ;;  %v669_v30 = vmax.f32 %v661_v27, %v665_v28  ;;  %v660_v31 = vld [vmem:[%s3547_s23 + $0x2] sm:$0x1]  ;;  %v663_v32 = vld [vmem:[%s3547_s23 + $0x32] sm:$0x1]  ;;  %s3783_s8 = scalar_lea.vmem [#allocation7], %s2750_s10 }
  0x58   : > { %2899 = vmatprep.subr.mxu0 %v3382_v0  ;;  %2910 = vmatprep.subr.mxu1 %v3382_v0  ;;  %v386_v22 = vrot.slane %v377_v19, 6  ;;  %v385_v24 = vsel %vm384_vm1, %v383_v21, %v375_v17  ;;  %v664_v33 = vld [vmem:[%s3547_s23 + $0x3] sm:$0x1]  ;;  %v667_v35 = vld [vmem:[%s3547_s23 + $0x33] sm:$0x1]  ;;  %s2793_s17 = sshll.u32 %s3358_s25, 3 }
  0x59   : > { %2900 = vmatpush3.msra.mxu0 %v3606_v7  ;;  %2911 = vmatpush3.msra.mxu1 %v3611_v8  ;;  %v666_v34 = vld [vmem:[%s3547_s23 + $0x23] sm:$0x1]  ;;  %v668_v36 = vmax.f32 %v660_v31, %v664_v33  ;;  %v676_v37 = vrot.slane %v669_v30, 7  ;;  %v671_v39 = vmax.f32 %v663_v32, %v667_v35  ;;  %v3668_v47 = vld [vmem:[%s3557_s14 + $0x8] sm:$0x1]  ;;  %s2618_s20 = sadd.s32 %s3354_s24, %s2793_s17  ;;  %s2621_s19 = sshll.u32 %s3783_s8, 4  ;;  %s4179_s19 = int_to_ptr.vmem [resolvable:$true] %s2621_s19 }
  0x5a   : > { %2915 = vmatprep.subr.mxu0 %v3382_v0  ;;  %2920 = vmatprep.subr.mxu1 %v3382_v0  ;;  %v388_v25 = vsel %vm387_vm2, %v386_v22, %v385_v24  ;;  %v670_v38 = vmax.f32 %v662_v29, %v666_v34  ;;  %v358_v45 = vld [vmem:[%s4245_s5] sm:$0xf]  ;;  %v3671_v48 = vld [vmem:[%s3557_s14 + $0x10] sm:$0x1]  ;;  %v544_v49 = vrot.slane %v3668_v47, 7  ;;  %s2794_s29 = sshll.u32 %s2618_s20, 7 }
  0x5b   : > { %v391_v26 = vsel %vm390_vm3, %v389_v23, %v388_v25  ;;  %v677_v40 = vsel %vm384_vm1, %v676_v37, %v668_v36  ;;  %v680_v42 = vrot.slane %v671_v39, 5  ;;  %3206 = vset.pattern.permute.xlu0 %v3384_v46  ;;  %v3675_v50 = vld [vmem:[%s3557_s14] sm:$0x1]  ;;  %v3678_v51 = vld [vmem:[%s3557_s14 + $0x18] sm:$0x1]  ;;  %v546_v52 = vrot.slane %v3671_v48, 6 }
  0x5c   : > { %2902 = vmatmul.mubr.msk.f32.vlgmr.msra.gmra.mxu0 %vm392_vm4, %v391_v26  ;;  %2913 = vmatmul.mubr.msk.f32.vlgmr.msra.gmra.mxu1 %vm392_vm4, %v391_v26  ;;  %v678_v41 = vrot.slane %v670_v38, 6  ;;  %v545_v53 = vsel %vm384_vm1, %v544_v49, %v3675_v50  ;;  %v548_v54 = vrot.slane %v3678_v51, 5  ;;  %v3689_v63 = vld [vmem:[%s4244_s4] sm:$0xf]  ;;  %v939_v11 = vld [vmem:[%s3547_s23 + $0x14] sm:$0x1] }
  0x5d   : > { %2917 = vmatprep.mubr.msk.f32.mxu0 %vm3383_vm0, %v3382_v0  ;;  %2921 = vmatpush3.msra.mxu1 %v3572_v1  ;;  %v547_v55 = vsel %vm387_vm2, %v546_v52, %v545_v53  ;;  %v943_v12 = vld [vmem:[%s3547_s23 + $0x15] sm:$0x1]  ;;  %v940_v13 = vld [vmem:[%s3547_s23 + $0x24] sm:$0x1]  ;;  %v944_v14 = vld [vmem:[%s3547_s23 + $0x25] sm:$0x1] }
  0x5e   : > { %2922 = vmatprep.subr.mxu1 %v3382_v0  ;;  %2928 = vmatprep.mubr.msk.f32.mxu1 %vm3383_vm0, %v3382_v0  ;;  %v679_v43 = vsel %vm387_vm2, %v678_v41, %v677_v40  ;;  %v549_v58 = vsel %vm390_vm3, %v548_v54, %v547_v55  ;;  %v947_v15 = vmax.f32 %v939_v11, %v943_v12  ;;  %v938_v16 = vld [vmem:[%s3547_s23 + $0x4] sm:$0x1]  ;;  %v941_v17 = vld [vmem:[%s3547_s23 + $0x34] sm:$0x1]  ;;  %v942_v18 = vld [vmem:[%s3547_s23 + $0x5] sm:$0x1] }
  0x5f   : > { %2923 = vmatpush3.msra.mxu1 %v3582_v3  ;;  %v681_v44 = vsel %vm390_vm3, %v680_v42, %v679_v43  ;;  %554 = vperm.xlu0 %3206, %v358_v45   ;;  %v948_v19 = vmax.f32 %v940_v13, %v944_v14  ;;  %v945_v20 = vld [vmem:[%s3547_s23 + $0x35] sm:$0x1]  ;;  %v946_v21 = vmax.f32 %v938_v16, %v942_v18  ;;  %v3731_v29 = vld [vmem:[%s3557_s14 + $0x9] sm:$0x1]  ;;  %v3736_v31 = vld [vmem:[%s3557_s14 + $0x11] sm:$0x1] }
  0x60   : > { %2924 = vmatprep.subr.mxu1 %v3382_v0  ;;  %v954_v22 = vrot.slane %v947_v15, 7  ;;  %v949_v23 = vmax.f32 %v941_v17, %v945_v20  ;;  %v833_v32 = vrot.slane %v3731_v29, 7  ;;  %v3740_v33 = vld [vmem:[%s3557_s14 + $0x1] sm:$0x1]  ;;  %v3744_v36 = vld [vmem:[%s3557_s14 + $0x19] sm:$0x1] }
  0x61   : > { %2925 = vmatpush3.msra.mxu1 %v3594_v5  ;;  %v956_v24 = vrot.slane %v948_v19, 6  ;;  %v835_v37 = vrot.slane %v3736_v31, 6  ;;  %v837_v41 = vrot.slane %v3744_v36, 5  ;;  %v1222_v11 = vld [vmem:[%s3547_s23 + $0x27] sm:$0x1]  ;;  %s4266_s7 = sld [smem:[#allocation21_spill]] }
  0x62   : > { %2926 = vmatprep.subr.mxu1 %v3382_v0  ;;  %v955_v25 = vsel %vm384_vm1, %v954_v22, %v946_v21  ;;  %v958_v27 = vrot.slane %v949_v23, 5  ;;  %v834_v39 = vsel %vm384_vm1, %v833_v32, %v3740_v33  ;;  %v1216_v13 = vld [vmem:[%s3547_s23 + $0x6] sm:$0x1]  ;;  %v1219_v14 = vld [vmem:[%s3547_s23 + $0x36] sm:$0x1]  ;;  %s2607_s24 = scalar_lea.sflag [#allocation4], %s3543_s18 }
  0x63   : > { %2927 = vmatpush3.msra.mxu1 %v3606_v7  ;;  %v957_v26 = vsel %vm387_vm2, %v956_v24, %v955_v25  ;;  %v836_v43 = vsel %vm387_vm2, %v835_v37, %v834_v39  ;;  %v1220_v15 = vld [vmem:[%s3547_s23 + $0x7] sm:$0x1]  ;;  %v1223_v17 = vld [vmem:[%s3547_s23 + $0x37] sm:$0x1]  ;;  %v3815_v32 = vld [vmem:[%s3557_s14 + $0x2] sm:$0x1] }
  0x64   : > { %2942 = vmatprep.subr.mxu1 %v3382_v0  ;;  %2929 = vmatmul.mubr.msk.f32.vlgmr.msra.gmra.mxu1 %vm392_vm4, %v681_v44  ;;  %v959_v28 = vsel %vm390_vm3, %v958_v27, %v957_v26  ;;  %v838_v45 = vsel %vm390_vm3, %v837_v41, %v836_v43  ;;  %v1224_v18 = vmax.f32 %v1216_v13, %v1220_v15  ;;  %v3808_v26 = vld [vmem:[%s3557_s14 + $0xa] sm:$0x1]  ;;  %v3811_v27 = vld [vmem:[%s3557_s14 + $0x12] sm:$0x1]  ;;  %v3819_v37 = vld [vmem:[%s3557_s14 + $0x1a] sm:$0x1] }
  0x65   : > { %2944 = vmatprep.mubr.msk.f32.mxu1 %vm3383_vm0, %v3382_v0  ;;  %v1227_v20 = vmax.f32 %v1219_v14, %v1223_v17  ;;  %v1501_v14 = vld [vmem:[%s3547_s23 + $0x39] sm:$0x1]  ;;  %s3270_s25 = scalar_lea.vmem %s4179_s19, 512  ;;  %s3385_s10 = smov [#allocation7]  }
  0x66   : > { %p3271_p3 = scmp.ne.s32.totalorder %s4179_s19, %s3270_s25  ;;  %s3274_s16 = sshll.u32 %s3385_s10, 4  ;;  %s3275_s16 = int_to_ptr.vmem [resolvable:$false] %s3274_s16 }
  0x67   : > { %v1236_v24 = vrot.slane %v1227_v20, 5  ;;  %s3276_s13 = scalar_lea.vmem %s3275_s16, 1024  ;;  %p3277_p1 = scmp.lt.s32.totalorder %s4179_s19, %s3275_s16 }
  0x68   : > { %p3272_p8 = pnand %p3271_p3, %p3488_p9  ;;  %p3278_p2 = scmp.lt.s32.totalorder %s3276_s13, %s3270_s25 }
  0x6a   : > { %p3273_p0 = pneg %p3272_p8  ;;  %p3279_p4 = por %p3278_p2, %p3277_p1 }
  0x6c   : > { %p3280_p5 = pnand %p3279_p4, %p3273_p0 }
  0xda   : > { %v3733_v30 = vpop.permute.xlu0 %554 }
 0x11c   : > { %v461_v56 = vpop.f32.mrf.mxu0  ;;  %v531_v57 = vpop.f32.mrf.mxu1 }
 0x11d   : > { %v535_v59 = vmax.f32 %v461_v56, %v531_v57 }
 0x11e   : > { %v2903_v60 = vpop.f32.mrf.mxu0  ;;  %v2914_v61 = vpop.f32.mrf.mxu1 }
 0x11f   : > { %v551_v62 = vadd.f32 %v549_v58, %v535_v59 }
 0x121   : > { %2916 = vmatpush3.msk.msra.mxu0 %vm561_vm5, %v551_v62 }
 0x122   : > { %2918 = vmatmul.mubr.msk.f32.vlgmr.msra.gmra.mxu0 %vm557_vm6, %v3689_v63  ;;  %2931 = vmatprep.subr.mxu0 %v3382_v0 }
 0x123   : > { %2932 = vmatpush3.msra.mxu0 %v3577_v2  ;;  %2939 = vmatprep.mubr.msk.f32.mxu0 %vm3383_vm0, %v3382_v0 }
 0x124   : > { %2933 = vmatprep.subr.mxu0 %v3382_v0  ;;  %v750_v9 = vpop.f32.mrf.mxu1 }
 0x125   : > { %2934 = vmatpush3.msra.mxu0 %v3589_v4 }
 0x126   : > { %2935 = vmatprep.subr.mxu0 %v3382_v0  ;;  %v2930_v10 = vpop.f32.mrf.mxu1 }
 0x127   : > { %2936 = vmatpush3.msra.mxu0 %v3599_v6  ;;  %v1218_v10 = vld [vmem:[%s3547_s23 + $0x26] sm:$0x1] }
 0x128   : > { %2937 = vmatprep.subr.mxu0 %v3382_v0  ;;  %v1226_v16 = vmax.f32 %v1218_v10, %v1222_v11  ;;  %v1496_v10 = vld [vmem:[%s3547_s23 + $0x28] sm:$0x1] }
 0x129   : > { %2938 = vmatpush3.msra.mxu0 %v3611_v8 }
 0x12a   : > { %2940 = vmatmul.mubr.msk.f32.vlgmr.msra.gmra.mxu0 %vm392_vm4, %v681_v44  ;;  %2947 = vmatprep.subr.mxu0 %v3382_v0  ;;  %v1234_v21 = vrot.slane %v1226_v16, 6 }
 0x12b   : > { %2948 = vmatpush3.msra.mxu0 %v3572_v1  ;;  %2955 = vmatprep.mubr.msk.f32.mxu0 %vm3383_vm0, %v3382_v0 }
 0x12c   : > { %2949 = vmatprep.subr.mxu0 %v3382_v0 }
 0x12d   : > { %2950 = vmatpush3.msra.mxu0 %v3582_v3 }
 0x12e   : > { %2951 = vmatprep.subr.mxu0 %v3382_v0 }
 0x12f   : > { %2952 = vmatpush3.msra.mxu0 %v3594_v5 }
 0x130   : > { %2953 = vmatprep.subr.mxu0 %v3382_v0 }
 0x131   : > { %2954 = vmatpush3.msra.mxu0 %v3606_v7 }
 0x132   : > { %2969 = vmatprep.subr.mxu0 %v3382_v0  ;;  %2956 = vmatmul.mubr.msk.f32.vlgmr.msra.gmra.mxu0 %vm392_vm4, %v959_v28 }
 0x133   : > { %2971 = vmatprep.mubr.msk.f32.mxu0 %vm3383_vm0, %v3382_v0 }
 0x1e2   : > { %v631_v34 = vpop.f32.mrf.mxu0 }
 0x1e3   : > { %v632_v35 = vadd.f32 %v631_v34, %v3733_v30 }
 0x1e4   : > { %v2919_v38 = vpop.f32.mrf.mxu0 }
 0x1e5   : > { %v635_v40 = vmax.f32 %v632_v35, 0.0  ;;  %v1113_v38 = vrot.slane %v3811_v27, 6 }
 0x1e7   : > { %v2756_v42 = vmul.f32 -1.442695, %v635_v40 }
 0x1e9   : > { %3207 = vpow2.f32 %v2756_v42  ;;  %v1115_v42 = vrot.slane %v3819_v37, 5 }
 0x1ea   : > { %v820_v44 = vpop.f32.mrf.mxu0 }
 0x1eb   : > { %v824_v46 = vmax.f32 %v750_v9, %v820_v44 }
 0x1ec   : > { %v2941_v49 = vpop.f32.mrf.mxu0 }
 0x1ed   : > { %v840_v52 = vadd.f32 %v838_v45, %v824_v46 }
 0x1ef   : > { %2943 = vmatpush3.msk.msra.mxu1 %vm561_vm5, %v840_v52 }
 0x1f0   : > { %2945 = vmatmul.mubr.msk.f32.vlgmr.msra.gmra.mxu1 %vm557_vm6, %v3689_v63  ;;  %2958 = vmatprep.subr.mxu1 %v3382_v0 }
 0x1f1   : > { %2959 = vmatpush3.msra.mxu1 %v3577_v2  ;;  %2966 = vmatprep.mubr.msk.f32.mxu1 %vm3383_vm0, %v3382_v0 }
 0x1f2   : > { %2960 = vmatprep.subr.mxu1 %v3382_v0 }
 0x1f3   : > { %2961 = vmatpush3.msra.mxu1 %v3589_v4 }
 0x1f4   : > { %2962 = vmatprep.subr.mxu1 %v3382_v0 }
 0x1f5   : > { %2963 = vmatpush3.msra.mxu1 %v3599_v6 }
 0x1f6   : > { %v3208_v53 = vpop.eup %3207  ;;  %2964 = vmatprep.subr.mxu1 %v3382_v0 }
 0x1f7   : > { %v639_v54 = vadd.f32 1.0, %v3208_v53  ;;  %2965 = vmatpush3.msra.mxu1 %v3611_v8 }
 0x1f8   : > { %2967 = vmatmul.mubr.msk.f32.vlgmr.msra.gmra.mxu1 %vm392_vm4, %v959_v28  ;;  %2974 = vmatprep.subr.mxu1 %v3382_v0  ;;  %v1111_v28 = vrot.slane %v3808_v26, 7 }
 0x1f9   : > { %3209 = vrcp.f32 %v639_v54  ;;  %2975 = vmatpush3.msra.mxu1 %v3572_v1  ;;  %2982 = vmatprep.mubr.msk.f32.mxu1 %vm3383_vm0, %v3382_v0 }
 0x1fa   : > { %2976 = vmatprep.subr.mxu1 %v3382_v0  ;;  %v1112_v40 = vsel %vm384_vm1, %v1111_v28, %v3815_v32  ;;  %v3886_v28 = vld [vmem:[%s3557_s14 + $0x3] sm:$0x1] }
 0x1fb   : > { %2977 = vmatpush3.msra.mxu1 %v3582_v3  ;;  %v1114_v44 = vsel %vm387_vm2, %v1113_v38, %v1112_v40  ;;  %v3890_v38 = vld [vmem:[%s3557_s14 + $0x1b] sm:$0x1] }
 0x1fc   : > { %2978 = vmatprep.subr.mxu1 %v3382_v0  ;;  %v1116_v46 = vsel %vm390_vm3, %v1115_v42, %v1114_v44 }
 0x1fd   : > { %2979 = vmatpush3.msra.mxu1 %v3594_v5 }
 0x1fe   : > { %2980 = vmatprep.subr.mxu1 %v3382_v0 }
 0x1ff   : > { %2981 = vmatpush3.msra.mxu1 %v3606_v7 }
 0x200   : > { %2996 = vmatprep.subr.mxu1 %v3382_v0 }
 0x206   : > { %v3210_v55 = vpop.eup %3209 }
 0x207   : > { %v642_v56 = vadd.f32 1.0, %v3210_v55 }
 0x209   : > { %v644_v57 = vrot.slane %v642_v56, 1  ;;  %v645_v58 = vrot.slane %v642_v56, 2  ;;  %v646_v59 = vrot.slane %v642_v56, 3  ;;  %v651_v60 = vmul.f32 %v642_v56, %v3675_v50  ;;  %v1217_v50 = vld [vmem:[%s3547_s23 + $0x16] sm:$0x1] }
 0x20b   : > { %v652_v61 = vmul.f32 %v644_v57, %v3668_v47  ;;  %v653_v62 = vmul.f32 %v645_v58, %v3671_v48  ;;  %v654_v9 = vmul.f32 %v646_v59, %v3678_v51  ;;  %656 = vst.msk [vmem:[%s3783_s8] sm:$0x1] %vm655_vm7, %v651_v60  ;;  %v1028_v47 = vpop.f32.mrf.mxu0  ;;  %v1221_v51 = vld [vmem:[%s3547_s23 + $0x17] sm:$0x1] }
 0x20c   : > { %v1225_v12 = vmax.f32 %v1217_v50, %v1221_v51  ;;  %v1499_v51 = vld [vmem:[%s3547_s23 + $0x19] sm:$0x1] }
 0x20d   : > { %657 = vst.msk [vmem:[%s3783_s8 + $0x8] sm:$0x1] %vm655_vm7, %v652_v61  ;;  %658 = vst.msk [vmem:[%s3783_s8 + $0x10] sm:$0x1] %vm655_vm7, %v653_v62  ;;  %v2957_v48 = vpop.f32.mrf.mxu0 }
 0x20e   : > { %659 = vst.msk [vmem:[%s3783_s8 + $0x18] sm:$0x1] %vm655_vm7, %v654_v9  ;;  %v1232_v19 = vrot.slane %v1225_v12, 7  ;;  %v1498_v12 = vld [vmem:[%s3547_s23 + $0x9] sm:$0x1] }
 0x210   : > { %v1233_v22 = vsel %vm384_vm1, %v1232_v19, %v1224_v18 }
 0x211   : > { %v1235_v23 = vsel %vm387_vm2, %v1234_v21, %v1233_v22 }
 0x212   : > { %v1237_v25 = vsel %vm390_vm3, %v1236_v24, %v1235_v23  ;;  %v3879_v23 = vld [vmem:[%s3557_s14 + $0xb] sm:$0x1]  ;;  %v3882_v24 = vld [vmem:[%s3557_s14 + $0x13] sm:$0x1] }
 0x213   : > { %2983 = vmatmul.mubr.msk.f32.vlgmr.msra.gmra.mxu1 %vm392_vm4, %v1237_v25 }
 0x214   : > { %2998 = vmatprep.mubr.msk.f32.mxu1 %vm3383_vm0, %v3382_v0 }
 0x2b0   : > { %v910_v34 = vpop.f32.mrf.mxu1 }
 0x2b1   : > { %v911_v35 = vadd.f32 %v910_v34, %v3733_v30 }
 0x2b2   : > { %v2946_v39 = vpop.f32.mrf.mxu1 }
 0x2b3   : > { %v914_v41 = vmax.f32 %v911_v35, 0.0  ;;  %v1391_v39 = vrot.slane %v3882_v24, 6 }
 0x2b5   : > { %v2761_v43 = vmul.f32 -1.442695, %v914_v41 }
 0x2b7   : > { %3211 = vpow2.f32 %v2761_v43  ;;  %v1393_v43 = vrot.slane %v3890_v38, 5 }
 0x2b8   : > { %v1098_v45 = vpop.f32.mrf.mxu1 }
 0x2b9   : > { %v1102_v49 = vmax.f32 %v1028_v47, %v1098_v45 }
 0x2ba   : > { %v2968_v52 = vpop.f32.mrf.mxu1 }
 0x2bb   : > { %v1118_v53 = vadd.f32 %v1116_v46, %v1102_v49 }
 0x2bd   : > { %2970 = vmatpush3.msk.msra.mxu0 %vm561_vm5, %v1118_v53 }
 0x2be   : > { %2972 = vmatmul.mubr.msk.f32.vlgmr.msra.gmra.mxu0 %vm557_vm6, %v3689_v63  ;;  %2985 = vmatprep.subr.mxu0 %v3382_v0 }
 0x2bf   : > { %2986 = vmatpush3.msra.mxu0 %v3577_v2  ;;  %2993 = vmatprep.mubr.msk.f32.mxu0 %vm3383_vm0, %v3382_v0 }
 0x2c0   : > { %2987 = vmatprep.subr.mxu0 %v3382_v0 }
 0x2c1   : > { %2988 = vmatpush3.msra.mxu0 %v3589_v4 }
 0x2c2   : > { %2989 = vmatprep.subr.mxu0 %v3382_v0 }
 0x2c3   : > { %2990 = vmatpush3.msra.mxu0 %v3599_v6 }
 0x2c4   : > { %v3212_v54 = vpop.eup %3211  ;;  %2991 = vmatprep.subr.mxu0 %v3382_v0 }
 0x2c5   : > { %v918_v55 = vadd.f32 1.0, %v3212_v54  ;;  %2992 = vmatpush3.msra.mxu0 %v3611_v8 }
 0x2c6   : > { %2994 = vmatmul.mubr.msk.f32.vlgmr.msra.gmra.mxu0 %vm392_vm4, %v1237_v25  ;;  %3001 = vmatprep.subr.mxu0 %v3382_v0  ;;  %v1389_v25 = vrot.slane %v3879_v23, 7 }
 0x2c7   : > { %3213 = vrcp.f32 %v918_v55  ;;  %3002 = vmatpush3.msra.mxu0 %v3572_v1  ;;  %3009 = vmatprep.mubr.msk.f32.mxu0 %vm3383_vm0, %v3382_v0 }
 0x2c8   : > { %3003 = vmatprep.subr.mxu0 %v3382_v0  ;;  %v1390_v41 = vsel %vm384_vm1, %v1389_v25, %v3886_v28  ;;  %v3957_v25 = vld [vmem:[%s3557_s14 + $0x4] sm:$0x1] }
 0x2c9   : > { %3004 = vmatpush3.msra.mxu0 %v3582_v3  ;;  %v1392_v45 = vsel %vm387_vm2, %v1391_v39, %v1390_v41  ;;  %v3961_v39 = vld [vmem:[%s3557_s14 + $0x1c] sm:$0x1] }
 0x2ca   : > { %3005 = vmatprep.subr.mxu0 %v3382_v0  ;;  %v1394_v49 = vsel %vm390_vm3, %v1393_v43, %v1392_v45 }
 0x2cb   : > { %3006 = vmatpush3.msra.mxu0 %v3594_v5 }
 0x2cc   : > { %3007 = vmatprep.subr.mxu0 %v3382_v0 }
 0x2cd   : > { %3008 = vmatpush3.msra.mxu0 %v3606_v7 }
 0x2ce   : > { %3023 = vmatprep.subr.mxu0 %v3382_v0 }
 0x2d3   : > { %v1306_v48 = vpop.f32.mrf.mxu1 }
 0x2d4   : > { %v3214_v56 = vpop.eup %3213 }
 0x2d5   : > { %v921_v57 = vadd.f32 1.0, %v3214_v56  ;;  %v2984_v50 = vpop.f32.mrf.mxu1 }
 0x2d7   : > { %v923_v58 = vrot.slane %v921_v57, 1  ;;  %v924_v59 = vrot.slane %v921_v57, 2  ;;  %v925_v60 = vrot.slane %v921_v57, 3  ;;  %v930_v61 = vmul.f32 %v921_v57, %v3740_v33  ;;  %v1495_v33 = vld [vmem:[%s3547_s23 + $0x18] sm:$0x1] }
 0x2d8   : > { %v1503_v11 = vmax.f32 %v1495_v33, %v1499_v51  ;;  %v1777_v51 = vld [vmem:[%s3547_s23 + $0x1b] sm:$0x1] }
 0x2d9   : > { %v931_v62 = vmul.f32 %v923_v58, %v3731_v29  ;;  %v932_v9 = vmul.f32 %v924_v59, %v3736_v31  ;;  %v933_v47 = vmul.f32 %v925_v60, %v3744_v36  ;;  %934 = vst.msk [vmem:[%s3783_s8 + $0x1] sm:$0x1] %vm655_vm7, %v930_v61  ;;  %v1500_v29 = vld [vmem:[%s3547_s23 + $0x29] sm:$0x1]  ;;  %v1494_v31 = vld [vmem:[%s3547_s23 + $0x8] sm:$0x1] }
 0x2da   : > { %v1497_v36 = vld [vmem:[%s3547_s23 + $0x38] sm:$0x1]  ;;  %v1504_v13 = vmax.f32 %v1496_v10, %v1500_v29  ;;  %v1502_v15 = vmax.f32 %v1494_v31, %v1498_v12  ;;  %v1510_v16 = vrot.slane %v1503_v11, 7  ;;  %v1774_v10 = vld [vmem:[%s3547_s23 + $0x2a] sm:$0x1] }
 0x2db   : > { %935 = vst.msk [vmem:[%s3783_s8 + $0x9] sm:$0x1] %vm655_vm7, %v931_v62  ;;  %936 = vst.msk [vmem:[%s3783_s8 + $0x11] sm:$0x1] %vm655_vm7, %v932_v9  ;;  %v1505_v17 = vmax.f32 %v1497_v36, %v1501_v14  ;;  %v1776_v11 = vld [vmem:[%s3547_s23 + $0xb] sm:$0x1] }
 0x2dc   : > { %937 = vst.msk [vmem:[%s3783_s8 + $0x19] sm:$0x1] %vm655_vm7, %v933_v47  ;;  %v1512_v18 = vrot.slane %v1504_v13, 6  ;;  %v1511_v19 = vsel %vm384_vm1, %v1510_v16, %v1502_v15  ;;  %v1779_v36 = vld [vmem:[%s3547_s23 + $0x3b] sm:$0x1] }
 0x2dd   : > { %v1514_v21 = vrot.slane %v1505_v17, 5 }
 0x2de   : > { %v1513_v20 = vsel %vm387_vm2, %v1512_v18, %v1511_v19 }
 0x2df   : > { %v1515_v22 = vsel %vm390_vm3, %v1514_v21, %v1513_v20  ;;  %v3950_v20 = vld [vmem:[%s3557_s14 + $0xc] sm:$0x1]  ;;  %v3953_v21 = vld [vmem:[%s3557_s14 + $0x14] sm:$0x1] }
 0x2e0   : > { %3010 = vmatmul.mubr.msk.f32.vlgmr.msra.gmra.mxu0 %vm392_vm4, %v1515_v22 }
 0x2e1   : > { %3025 = vmatprep.mubr.msk.f32.mxu0 %vm3383_vm0, %v3382_v0 }
 0x37e   : > { %v1188_v34 = vpop.f32.mrf.mxu0 }
 0x37f   : > { %v1189_v35 = vadd.f32 %v1188_v34, %v3733_v30 }
 0x380   : > { %v2973_v40 = vpop.f32.mrf.mxu0 }
 0x381   : > { %v1192_v42 = vmax.f32 %v1189_v35, 0.0  ;;  %v1669_v40 = vrot.slane %v3953_v21, 6 }
 0x383   : > { %v2766_v44 = vmul.f32 -1.442695, %v1192_v42 }
 0x385   : > { %3215 = vpow2.f32 %v2766_v44  ;;  %v1671_v44 = vrot.slane %v3961_v39, 5 }
 0x386   : > { %v1376_v46 = vpop.f32.mrf.mxu0 }
 0x387   : > { %v1380_v52 = vmax.f32 %v1306_v48, %v1376_v46 }
 0x388   : > { %v2995_v53 = vpop.f32.mrf.mxu0 }
 0x389   : > { %v1396_v54 = vadd.f32 %v1394_v49, %v1380_v52 }
 0x38b   : > { %2997 = vmatpush3.msk.msra.mxu1 %vm561_vm5, %v1396_v54 }
 0x38c   : > { %2999 = vmatmul.mubr.msk.f32.vlgmr.msra.gmra.mxu1 %vm557_vm6, %v3689_v63  ;;  %3012 = vmatprep.subr.mxu1 %v3382_v0 }
 0x38d   : > { %3013 = vmatpush3.msra.mxu1 %v3577_v2  ;;  %3020 = vmatprep.mubr.msk.f32.mxu1 %vm3383_vm0, %v3382_v0 }
 0x38e   : > { %3014 = vmatprep.subr.mxu1 %v3382_v0 }
 0x38f   : > { %3015 = vmatpush3.msra.mxu1 %v3589_v4 }
 0x390   : > { %3016 = vmatprep.subr.mxu1 %v3382_v0 }
 0x391   : > { %3017 = vmatpush3.msra.mxu1 %v3599_v6 }
 0x392   : > { %v3216_v55 = vpop.eup %3215  ;;  %3018 = vmatprep.subr.mxu1 %v3382_v0 }
 0x393   : > { %v1196_v56 = vadd.f32 1.0, %v3216_v55  ;;  %3019 = vmatpush3.msra.mxu1 %v3611_v8 }
 0x394   : > { %3021 = vmatmul.mubr.msk.f32.vlgmr.msra.gmra.mxu1 %vm392_vm4, %v1515_v22  ;;  %3028 = vmatprep.subr.mxu1 %v3382_v0  ;;  %v1667_v22 = vrot.slane %v3950_v20, 7 }
 0x395   : > { %3217 = vrcp.f32 %v1196_v56  ;;  %3029 = vmatpush3.msra.mxu1 %v3572_v1  ;;  %3036 = vmatprep.mubr.msk.f32.mxu1 %vm3383_vm0, %v3382_v0 }
 0x396   : > { %3030 = vmatprep.subr.mxu1 %v3382_v0  ;;  %v1668_v42 = vsel %vm384_vm1, %v1667_v22, %v3957_v25  ;;  %v4028_v22 = vld [vmem:[%s3557_s14 + $0x5] sm:$0x1] }
 0x397   : > { %3031 = vmatpush3.msra.mxu1 %v3582_v3  ;;  %v1670_v46 = vsel %vm387_vm2, %v1669_v40, %v1668_v42  ;;  %v4032_v40 = vld [vmem:[%s3557_s14 + $0x1d] sm:$0x1] }
 0x398   : > { %3032 = vmatprep.subr.mxu1 %v3382_v0  ;;  %v1672_v52 = vsel %vm390_vm3, %v1671_v44, %v1670_v46 }
 0x399   : > { %3033 = vmatpush3.msra.mxu1 %v3594_v5 }
 0x39a   : > { %3034 = vmatprep.subr.mxu1 %v3382_v0 }
 0x39b   : > { %3035 = vmatpush3.msra.mxu1 %v3606_v7 }
 0x39c   : > { %3050 = vmatprep.subr.mxu1 %v3382_v0 }
 0x3a0   : > { %v1584_v50 = vpop.f32.mrf.mxu0 }
 0x3a2   : > { %v3218_v57 = vpop.eup %3217  ;;  %v3011_v33 = vpop.f32.mrf.mxu0 }
 0x3a3   : > { %v1199_v58 = vadd.f32 1.0, %v3218_v57 }
 0x3a5   : > { %v1201_v59 = vrot.slane %v1199_v58, 1  ;;  %v1202_v60 = vrot.slane %v1199_v58, 2  ;;  %v1203_v61 = vrot.slane %v1199_v58, 3  ;;  %v1208_v62 = vmul.f32 %v1199_v58, %v3815_v32  ;;  %v1773_v32 = vld [vmem:[%s3547_s23 + $0x1a] sm:$0x1] }
 0x3a6   : > { %v1781_v29 = vmax.f32 %v1773_v32, %v1777_v51  ;;  %v2055_v51 = vld [vmem:[%s3547_s23 + $0x1d] sm:$0x1] }
 0x3a7   : > { %v1209_v9 = vmul.f32 %v1201_v59, %v3808_v26  ;;  %v1210_v47 = vmul.f32 %v1202_v60, %v3811_v27  ;;  %v1211_v48 = vmul.f32 %v1203_v61, %v3819_v37  ;;  %1212 = vst.msk [vmem:[%s3783_s8 + $0x2] sm:$0x1] %vm655_vm7, %v1208_v62  ;;  %v1778_v26 = vld [vmem:[%s3547_s23 + $0x2b] sm:$0x1]  ;;  %v1772_v27 = vld [vmem:[%s3547_s23 + $0xa] sm:$0x1] }
 0x3a8   : > { %v1775_v37 = vld [vmem:[%s3547_s23 + $0x3a] sm:$0x1]  ;;  %v1782_v31 = vmax.f32 %v1774_v10, %v1778_v26  ;;  %v1780_v12 = vmax.f32 %v1772_v27, %v1776_v11  ;;  %v1788_v13 = vrot.slane %v1781_v29, 7  ;;  %v2052_v10 = vld [vmem:[%s3547_s23 + $0x2c] sm:$0x1] }
 0x3a9   : > { %1213 = vst.msk [vmem:[%s3783_s8 + $0xa] sm:$0x1] %vm655_vm7, %v1209_v9  ;;  %1214 = vst.msk [vmem:[%s3783_s8 + $0x12] sm:$0x1] %vm655_vm7, %v1210_v47  ;;  %v1783_v14 = vmax.f32 %v1775_v37, %v1779_v36  ;;  %v2054_v29 = vld [vmem:[%s3547_s23 + $0xd] sm:$0x1] }
 0x3aa   : > { %1215 = vst.msk [vmem:[%s3783_s8 + $0x1a] sm:$0x1] %vm655_vm7, %v1211_v48  ;;  %v1790_v15 = vrot.slane %v1782_v31, 6  ;;  %v1789_v16 = vsel %vm384_vm1, %v1788_v13, %v1780_v12  ;;  %v2057_v37 = vld [vmem:[%s3547_s23 + $0x3d] sm:$0x1] }
 0x3ab   : > { %v1792_v18 = vrot.slane %v1783_v14, 5 }
 0x3ac   : > { %v1791_v17 = vsel %vm387_vm2, %v1790_v15, %v1789_v16 }
 0x3ad   : > { %v1793_v19 = vsel %vm390_vm3, %v1792_v18, %v1791_v17  ;;  %v4021_v17 = vld [vmem:[%s3557_s14 + $0xd] sm:$0x1]  ;;  %v4024_v18 = vld [vmem:[%s3557_s14 + $0x15] sm:$0x1] }
 0x3ae   : > { %3037 = vmatmul.mubr.msk.f32.vlgmr.msra.gmra.mxu1 %vm392_vm4, %v1793_v19 }
 0x3af   : > { %3052 = vmatprep.mubr.msk.f32.mxu1 %vm3383_vm0, %v3382_v0 }
 0x44c   : > { %v1466_v34 = vpop.f32.mrf.mxu1 }
 0x44d   : > { %v1467_v35 = vadd.f32 %v1466_v34, %v3733_v30 }
 0x44e   : > { %v3000_v41 = vpop.f32.mrf.mxu1 }
 0x44f   : > { %v1470_v43 = vmax.f32 %v1467_v35, 0.0  ;;  %v1947_v41 = vrot.slane %v4024_v18, 6 }
 0x451   : > { %v2771_v45 = vmul.f32 -1.442695, %v1470_v43 }
 0x453   : > { %3219 = vpow2.f32 %v2771_v45  ;;  %v1949_v45 = vrot.slane %v4032_v40, 5 }
 0x454   : > { %v1654_v49 = vpop.f32.mrf.mxu1 }
 0x455   : > { %v1658_v53 = vmax.f32 %v1584_v50, %v1654_v49 }
 0x456   : > { %v3022_v54 = vpop.f32.mrf.mxu1 }
 0x457   : > { %v1674_v55 = vadd.f32 %v1672_v52, %v1658_v53 }
 0x459   : > { %3024 = vmatpush3.msk.msra.mxu0 %vm561_vm5, %v1674_v55 }
 0x45a   : > { %3026 = vmatmul.mubr.msk.f32.vlgmr.msra.gmra.mxu0 %vm557_vm6, %v3689_v63  ;;  %3039 = vmatprep.subr.mxu0 %v3382_v0 }
 0x45b   : > { %3040 = vmatpush3.msra.mxu0 %v3577_v2  ;;  %3047 = vmatprep.mubr.msk.f32.mxu0 %vm3383_vm0, %v3382_v0 }
 0x45c   : > { %3041 = vmatprep.subr.mxu0 %v3382_v0 }
 0x45d   : > { %3042 = vmatpush3.msra.mxu0 %v3589_v4 }
 0x45e   : > { %3043 = vmatprep.subr.mxu0 %v3382_v0 }
 0x45f   : > { %3044 = vmatpush3.msra.mxu0 %v3599_v6 }
 0x460   : > { %v3220_v56 = vpop.eup %3219  ;;  %3045 = vmatprep.subr.mxu0 %v3382_v0 }
 0x461   : > { %v1474_v57 = vadd.f32 1.0, %v3220_v56  ;;  %3046 = vmatpush3.msra.mxu0 %v3611_v8 }
 0x462   : > { %3048 = vmatmul.mubr.msk.f32.vlgmr.msra.gmra.mxu0 %vm392_vm4, %v1793_v19  ;;  %3055 = vmatprep.subr.mxu0 %v3382_v0  ;;  %v1945_v19 = vrot.slane %v4021_v17, 7 }
 0x463   : > { %3221 = vrcp.f32 %v1474_v57  ;;  %3056 = vmatpush3.msra.mxu0 %v3572_v1  ;;  %3063 = vmatprep.mubr.msk.f32.mxu0 %vm3383_vm0, %v3382_v0 }
 0x464   : > { %3057 = vmatprep.subr.mxu0 %v3382_v0  ;;  %v1946_v43 = vsel %vm384_vm1, %v1945_v19, %v4028_v22 }
 0x465   : > { %3058 = vmatpush3.msra.mxu0 %v3582_v3  ;;  %v1948_v49 = vsel %vm387_vm2, %v1947_v41, %v1946_v43 }
 0x466   : > { %3059 = vmatprep.subr.mxu0 %v3382_v0  ;;  %v1950_v53 = vsel %vm390_vm3, %v1949_v45, %v1948_v49  ;;  %v3240_v49 = vld [vmem:[%s4243_s3 + $0x10] sm:$0xff] }
 0x467   : > { %3060 = vmatpush3.msra.mxu0 %v3594_v5 }
 0x468   : > { %3061 = vmatprep.subr.mxu0 %v3382_v0 }
 0x469   : > { %3062 = vmatpush3.msra.mxu0 %v3606_v7 }
 0x46a   : > { %3077 = vmatprep.subr.mxu0 %v3382_v0 }
 0x46e   : > { %v1862_v33 = vpop.f32.mrf.mxu1 }
 0x470   : > { %v3222_v58 = vpop.eup %3221  ;;  %v3038_v32 = vpop.f32.mrf.mxu1 }
 0x471   : > { %v1477_v59 = vadd.f32 1.0, %v3222_v58 }
 0x473   : > { %v1479_v60 = vrot.slane %v1477_v59, 1  ;;  %v1480_v61 = vrot.slane %v1477_v59, 2  ;;  %v1481_v62 = vrot.slane %v1477_v59, 3  ;;  %v1486_v9 = vmul.f32 %v1477_v59, %v3886_v28  ;;  %v2051_v28 = vld [vmem:[%s3547_s23 + $0x1c] sm:$0x1] }
 0x474   : > { %v2059_v26 = vmax.f32 %v2051_v28, %v2055_v51 }
 0x475   : > { %v1487_v47 = vmul.f32 %v1479_v60, %v3879_v23  ;;  %v1488_v48 = vmul.f32 %v1480_v61, %v3882_v24  ;;  %v1489_v50 = vmul.f32 %v1481_v62, %v3890_v38  ;;  %1490 = vst.msk [vmem:[%s3783_s8 + $0x3] sm:$0x1] %vm655_vm7, %v1486_v9  ;;  %v2056_v23 = vld [vmem:[%s3547_s23 + $0x2d] sm:$0x1]  ;;  %v2050_v24 = vld [vmem:[%s3547_s23 + $0xc] sm:$0x1] }
 0x476   : > { %v2053_v38 = vld [vmem:[%s3547_s23 + $0x3c] sm:$0x1]  ;;  %v2060_v27 = vmax.f32 %v2052_v10, %v2056_v23  ;;  %v2058_v11 = vmax.f32 %v2050_v24, %v2054_v29  ;;  %v2066_v31 = vrot.slane %v2059_v26, 7  ;;  %v2333_v62 = vld [vmem:[%s3547_s23 + $0x1f] sm:$0x1] }
 0x477   : > { %1491 = vst.msk [vmem:[%s3783_s8 + $0xb] sm:$0x1] %vm655_vm7, %v1487_v47  ;;  %1492 = vst.msk [vmem:[%s3783_s8 + $0x13] sm:$0x1] %vm655_vm7, %v1488_v48  ;;  %v2061_v36 = vmax.f32 %v2053_v38, %v2057_v37  ;;  %v2330_v9 = vld [vmem:[%s3547_s23 + $0x2e] sm:$0x1] }
 0x478   : > { %1493 = vst.msk [vmem:[%s3783_s8 + $0x1b] sm:$0x1] %vm655_vm7, %v1489_v50  ;;  %v2068_v12 = vrot.slane %v2060_v27, 6  ;;  %v2067_v13 = vsel %vm384_vm1, %v2066_v31, %v2058_v11  ;;  %v2332_v48 = vld [vmem:[%s3547_s23 + $0xf] sm:$0x1] }
 0x479   : > { %v2070_v15 = vrot.slane %v2061_v36, 5  ;;  %v4092_v29 = vld [vmem:[%s3557_s14 + $0xe] sm:$0x1]  ;;  %v4095_v27 = vld [vmem:[%s3557_s14 + $0x16] sm:$0x1] }
 0x47a   : > { %v2069_v14 = vsel %vm387_vm2, %v2068_v12, %v2067_v13  ;;  %v2223_v37 = vrot.slane %v4092_v29, 7  ;;  %v4099_v11 = vld [vmem:[%s3557_s14 + $0x6] sm:$0x1]  ;;  %v4103_v12 = vld [vmem:[%s3557_s14 + $0x1e] sm:$0x1]  ;;  %v2225_v13 = vrot.slane %v4095_v27, 6 }
 0x47b   : > { %v2071_v16 = vsel %vm390_vm3, %v2070_v15, %v2069_v14  ;;  %v2227_v19 = vrot.slane %v4103_v12, 5 }
 0x47c   : > { %3064 = vmatmul.mubr.msk.f32.vlgmr.msra.gmra.mxu0 %vm392_vm4, %v2071_v16  ;;  %v2224_v15 = vsel %vm384_vm1, %v2223_v37, %v4099_v11 }
 0x47d   : > { %3079 = vmatprep.mubr.msk.f32.mxu0 %vm3383_vm0, %v3382_v0 }
 0x51a   : > { %v1744_v34 = vpop.f32.mrf.mxu0 }
 0x51b   : > { %v1745_v35 = vadd.f32 %v1744_v34, %v3733_v30 }
 0x51c   : > { %v3027_v42 = vpop.f32.mrf.mxu0 }
 0x51d   : > { %v1748_v44 = vmax.f32 %v1745_v35, 0.0  ;;  %v2226_v35 = vsel %vm387_vm2, %v2225_v13, %v2224_v15 }
 0x51e   : > { %v2228_v42 = vsel %vm390_vm3, %v2227_v19, %v2226_v35 }
 0x51f   : > { %v2776_v46 = vmul.f32 -1.442695, %v1748_v44 }
 0x521   : > { %3223 = vpow2.f32 %v2776_v46  ;;  %v3239_v46 = vld [vmem:[%s4243_s3 + $0x18] sm:$0xff] }
 0x522   : > { %v1932_v52 = vpop.f32.mrf.mxu0 }
 0x523   : > { %v1936_v54 = vmax.f32 %v1862_v33, %v1932_v52  ;;  %v2335_v33 = vld [vmem:[%s3547_s23 + $0x3f] sm:$0x1] }
 0x524   : > { %v3049_v55 = vpop.f32.mrf.mxu0 }
 0x525   : > { %v1952_v56 = vadd.f32 %v1950_v53, %v1936_v54  ;;  %v3242_v54 = vld [vmem:[%s4243_s3] sm:$0xff] }
 0x527   : > { %3051 = vmatpush3.msk.msra.mxu1 %vm561_vm5, %v1952_v56 }
 0x528   : > { %3053 = vmatmul.mubr.msk.f32.vlgmr.msra.gmra.mxu1 %vm557_vm6, %v3689_v63  ;;  %3066 = vmatprep.subr.mxu1 %v3382_v0 }
 0x529   : > { %3067 = vmatpush3.msra.mxu1 %v3577_v2  ;;  %3074 = vmatprep.mubr.msk.f32.mxu1 %vm3383_vm0, %v3382_v0 }
 0x52a   : > { %3068 = vmatprep.subr.mxu1 %v3382_v0 }
 0x52b   : > { %3069 = vmatpush3.msra.mxu1 %v3589_v4 }
 0x52c   : > { %3070 = vmatprep.subr.mxu1 %v3382_v0 }
 0x52d   : > { %3071 = vmatpush3.msra.mxu1 %v3599_v6 }
 0x52e   : > { %v3224_v57 = vpop.eup %3223  ;;  %3072 = vmatprep.subr.mxu1 %v3382_v0 }
 0x52f   : > { %v1752_v58 = vadd.f32 1.0, %v3224_v57  ;;  %3073 = vmatpush3.msra.mxu1 %v3611_v8 }
 0x530   : > { %3075 = vmatmul.mubr.msk.f32.vlgmr.msra.gmra.mxu1 %vm392_vm4, %v2071_v16  ;;  %3082 = vmatprep.subr.mxu1 %v3382_v0 }
 0x531   : > { %3225 = vrcp.f32 %v1752_v58  ;;  %3083 = vmatpush3.msra.mxu1 %v3572_v1  ;;  %3090 = vmatprep.mubr.msk.f32.mxu1 %vm3383_vm0, %v3382_v0 }
 0x532   : > { %3084 = vmatprep.subr.mxu1 %v3382_v0 }
 0x533   : > { %3085 = vmatpush3.msra.mxu1 %v3582_v3 }
 0x534   : > { %3086 = vmatprep.subr.mxu1 %v3382_v0 }
 0x535   : > { %3087 = vmatpush3.msra.mxu1 %v3594_v5 }
 0x536   : > { %3088 = vmatprep.subr.mxu1 %v3382_v0 }
 0x537   : > { %3089 = vmatpush3.msra.mxu1 %v3606_v7 }
 0x538   : > { %3104 = vmatprep.subr.mxu1 %v3382_v0 }
 0x53c   : > { %v2140_v60 = vpop.f32.mrf.mxu0 }
 0x53e   : > { %v3226_v1 = vpop.eup %3225  ;;  %v3065_v61 = vpop.f32.mrf.mxu0 }
 0x53f   : > { %v1755_v2 = vadd.f32 1.0, %v3226_v1 }
 0x541   : > { %v1757_v4 = vrot.slane %v1755_v2, 1  ;;  %v1758_v3 = vrot.slane %v1755_v2, 2  ;;  %v1759_v6 = vrot.slane %v1755_v2, 3  ;;  %v1764_v8 = vmul.f32 %v1755_v2, %v3957_v25  ;;  %v2329_v25 = vld [vmem:[%s3547_s23 + $0x1e] sm:$0x1] }
 0x542   : > { %v2337_v47 = vmax.f32 %v2329_v25, %v2333_v62 }
 0x543   : > { %v1765_v5 = vmul.f32 %v1757_v4, %v3950_v20  ;;  %v1766_v7 = vmul.f32 %v1758_v3, %v3953_v21  ;;  %v1767_v59 = vmul.f32 %v1759_v6, %v3961_v39  ;;  %1768 = vst.msk [vmem:[%s3783_s8 + $0x4] sm:$0x1] %vm655_vm7, %v1764_v8  ;;  %v2334_v20 = vld [vmem:[%s3547_s23 + $0x2f] sm:$0x1]  ;;  %v2328_v21 = vld [vmem:[%s3547_s23 + $0xe] sm:$0x1] }
 0x544   : > { %v2331_v39 = vld [vmem:[%s3547_s23 + $0x3e] sm:$0x1]  ;;  %v2338_v50 = vmax.f32 %v2330_v9, %v2334_v20  ;;  %v2336_v32 = vmax.f32 %v2328_v21, %v2332_v48  ;;  %v2344_v28 = vrot.slane %v2337_v47, 7  ;;  %s4177_s23 = scalar_lea.hbm %s4266_s7, %s2794_s29 }
 0x545   : > { %1769 = vst.msk [vmem:[%s3783_s8 + $0xc] sm:$0x1] %vm655_vm7, %v1765_v5  ;;  %1770 = vst.msk [vmem:[%s3783_s8 + $0x14] sm:$0x1] %vm655_vm7, %v1766_v7  ;;  %v2339_v51 = vmax.f32 %v2331_v39, %v2335_v33  ;;  %v2494_v5 = vld [vmem:[%s3557_s14 + $0xf] sm:$0x1] }
 0x546   : > { %1771 = vst.msk [vmem:[%s3783_s8 + $0x1c] sm:$0x1] %vm655_vm7, %v1767_v59  ;;  %v2346_v10 = vrot.slane %v2338_v50, 6  ;;  %v2345_v23 = vsel %vm384_vm1, %v2344_v28, %v2336_v32  ;;  %v2495_v7 = vld [vmem:[%s3557_s14 + $0x17] sm:$0x1] }
 0x547   : > { %v2348_v24 = vrot.slane %v2339_v51, 5  ;;  %v2493_v59 = vld [vmem:[%s3557_s14 + $0x7] sm:$0x1]  ;;  %v2503_v61 = vrot.slane %v2495_v7, 6  ;;  %v3243_v32 = vld [vmem:[%s4244_s4] sm:$0xf] }
 0x548   : > { %v2347_v26 = vsel %vm387_vm2, %v2346_v10, %v2345_v23 }
 0x549   : > { %v2349_v38 = vsel %vm390_vm3, %v2348_v24, %v2347_v26 }
 0x54a   : > { %3091 = vmatmul.mubr.msk.f32.vlgmr.msra.gmra.mxu1 %vm392_vm4, %v2349_v38 }
 0x54b   : > { %3106 = vmatprep.mubr.msk.f32.mxu1 %vm3383_vm0, %v3382_v0 }
 0x5e8   : > { %v2022_v31 = vpop.f32.mrf.mxu1 }
 0x5e9   : > { %v2023_v36 = vadd.f32 %v2022_v31, %v3733_v30 }
 0x5ea   : > { %v3054_v14 = vpop.f32.mrf.mxu1 }
 0x5eb   : > { %v2026_v16 = vmax.f32 %v2023_v36, 0.0 }
 0x5ed   : > { %v2781_v34 = vmul.f32 -1.442695, %v2026_v16 }
 0x5ef   : > { %3227 = vpow2.f32 %v2781_v34 }
 0x5f0   : > { %v2210_v41 = vpop.f32.mrf.mxu1 }
 0x5f1   : > { %v2214_v43 = vmax.f32 %v2140_v60, %v2210_v41 }
 0x5f2   : > { %v3076_v44 = vpop.f32.mrf.mxu1 }
 0x5f3   : > { %v2230_v45 = vadd.f32 %v2228_v42, %v2214_v43 }
 0x5f5   : > { %3078 = vmatpush3.msk.msra.mxu0 %vm561_vm5, %v2230_v45 }
 0x5f6   : > { %3080 = vmatmul.mubr.msk.f32.vlgmr.msra.gmra.mxu0 %vm557_vm6, %v3689_v63  ;;  %3093 = vmatprep.subr.mxu0 %v3382_v0  ;;  %v3241_v63 = vld [vmem:[%s4243_s3 + $0x8] sm:$0xff] }
 0x5f7   : > { %3094 = vmatpush3.msra.mxu0 %v3239_v46  ;;  %3101 = vmatprep.mubr.msk.f32.mxu0 %vm3383_vm0, %v3382_v0 }
 0x5f8   : > { %3095 = vmatprep.subr.mxu0 %v3382_v0 }
 0x5f9   : > { %3096 = vmatpush3.msra.mxu0 %v3240_v49 }
 0x5fa   : > { %3097 = vmatprep.subr.mxu0 %v3382_v0 }
 0x5fb   : > { %3098 = vmatpush3.msra.mxu0 %v3241_v63 }
 0x5fc   : > { %v3228_v52 = vpop.eup %3227  ;;  %3099 = vmatprep.subr.mxu0 %v3382_v0 }
 0x5fd   : > { %v2030_v53 = vadd.f32 1.0, %v3228_v52  ;;  %3100 = vmatpush3.msra.mxu0 %v3242_v54 }
 0x5fe   : > { %3102 = vmatmul.mubr.msk.f32.vlgmr.msra.gmra.mxu0 %vm392_vm4, %v2349_v38 }
 0x5ff   : > { %3229 = vrcp.f32 %v2030_v53 }
 0x60a   : > { %v2418_v6 = vpop.f32.mrf.mxu1 }
 0x60c   : > { %v3230_v55 = vpop.eup %3229  ;;  %v3092_v8 = vpop.f32.mrf.mxu1 }
 0x60d   : > { %v2033_v56 = vadd.f32 1.0, %v3230_v55 }
 0x60f   : > { %v2035_v57 = vrot.slane %v2033_v56, 1  ;;  %v2036_v58 = vrot.slane %v2033_v56, 2  ;;  %v2037_v0 = vrot.slane %v2033_v56, 3  ;;  %v2042_v1 = vmul.f32 %v2033_v56, %v4028_v22 }
 0x610   : > { %v2501_v22 = vrot.slane %v2494_v5, 7 }
 0x611   : > { %v2043_v2 = vmul.f32 %v2035_v57, %v4021_v17  ;;  %v2044_v4 = vmul.f32 %v2036_v58, %v4024_v18  ;;  %v2045_v3 = vmul.f32 %v2037_v0, %v4032_v40  ;;  %2046 = vst.msk [vmem:[%s3783_s8 + $0x5] sm:$0x1] %vm655_vm7, %v2042_v1  ;;  %v2496_v18 = vld [vmem:[%s3557_s14 + $0x1f] sm:$0x1] }
 0x612   : > { %v2502_v25 = vsel %vm384_vm1, %v2501_v22, %v2493_v59  ;;  %v2505_v9 = vrot.slane %v2496_v18, 5 }
 0x613   : > { %2047 = vst.msk [vmem:[%s3783_s8 + $0xd] sm:$0x1] %vm655_vm7, %v2043_v2  ;;  %2048 = vst.msk [vmem:[%s3783_s8 + $0x15] sm:$0x1] %vm655_vm7, %v2044_v4  ;;  %v2504_v47 = vsel %vm387_vm2, %v2503_v61, %v2502_v25 }
 0x614   : > { %2049 = vst.msk [vmem:[%s3783_s8 + $0x1d] sm:$0x1] %vm655_vm7, %v2045_v3  ;;  %v2506_v39 = vsel %vm390_vm3, %v2505_v9, %v2504_v47 }
 0x6b6   : > { %v2300_v60 = vpop.f32.mrf.mxu0 }
 0x6b7   : > { %v2301_v17 = vadd.f32 %v2300_v60, %v3733_v30 }
 0x6b8   : > { %v3081_v40 = vpop.f32.mrf.mxu0 }
 0x6b9   : > { %v2304_v62 = vmax.f32 %v2301_v17, 0.0 }
 0x6bb   : > { %v2786_v20 = vmul.f32 -1.442695, %v2304_v62 }
 0x6bd   : > { %3231 = vpow2.f32 %v2786_v20 }
 0x6be   : > { %v2488_v21 = vpop.f32.mrf.mxu0 }
 0x6bf   : > { %v2492_v48 = vmax.f32 %v2418_v6, %v2488_v21 }
 0x6c0   : > { %v3103_v50 = vpop.f32.mrf.mxu0 }
 0x6c1   : > { %v2508_v33 = vadd.f32 %v2506_v39, %v2492_v48 }
 0x6c3   : > { %3105 = vmatpush3.msk.msra.mxu1 %vm561_vm5, %v2508_v33 }
 0x6c4   : > { %3107 = vmatmul.mubr.msk.f32.vlgmr.msra.gmra.mxu1 %vm557_vm6, %v3243_v32 }
 0x6ca   : > { %v3232_v28 = vpop.eup %3231 }
 0x6cb   : > { %v2308_v51 = vadd.f32 1.0, %v3232_v28 }
 0x6cd   : > { %3233 = vrcp.f32 %v2308_v51 }
 0x6da   : > { %v3234_v10 = vpop.eup %3233 }
 0x6db   : > { %v2311_v23 = vadd.f32 1.0, %v3234_v10 }
 0x6dd   : > { %v2313_v26 = vrot.slane %v2311_v23, 1  ;;  %v2314_v24 = vrot.slane %v2311_v23, 2  ;;  %v2315_v38 = vrot.slane %v2311_v23, 3  ;;  %v2320_v37 = vmul.f32 %v2311_v23, %v4099_v11 }
 0x6df   : > { %v2321_v31 = vmul.f32 %v2313_v26, %v4092_v29  ;;  %v2322_v36 = vmul.f32 %v2314_v24, %v4095_v27  ;;  %v2323_v13 = vmul.f32 %v2315_v38, %v4103_v12  ;;  %2324 = vst.msk [vmem:[%s3783_s8 + $0x6] sm:$0x1] %vm655_vm7, %v2320_v37 }
 0x6e1   : > { %2325 = vst.msk [vmem:[%s3783_s8 + $0xe] sm:$0x1] %vm655_vm7, %v2321_v31  ;;  %2326 = vst.msk [vmem:[%s3783_s8 + $0x16] sm:$0x1] %vm655_vm7, %v2322_v36 }
 0x6e2   : > { %2327 = vst.msk [vmem:[%s3783_s8 + $0x1e] sm:$0x1] %vm655_vm7, %v2323_v13 }
 0x784   : > { %v2578_v14 = vpop.f32.mrf.mxu1 }
 0x785   : > { %v2579_v11 = vadd.f32 %v2578_v14, %v3733_v30 }
 0x786   : > { %v3108_v15 = vpop.f32.mrf.mxu1 }
 0x787   : > { %v2582_v29 = vmax.f32 %v2579_v11, 0.0 }
 0x789   : > { %v2791_v16 = vmul.f32 -1.442695, %v2582_v29 }
 0x78b   : > { %3235 = vpow2.f32 %v2791_v16 }
 0x798   : > { %v3236_v27 = vpop.eup %3235 }
 0x799   : > { %v2586_v19 = vadd.f32 1.0, %v3236_v27 }
 0x79b   : > { %3237 = vrcp.f32 %v2586_v19 }
 0x7a8   : > { %v3238_v12 = vpop.eup %3237 }
 0x7a9   : > { %v2589_v34 = vadd.f32 1.0, %v3238_v12 }
 0x7ab   : > { %v2591_v35 = vrot.slane %v2589_v34, 1  ;;  %v2592_v30 = vrot.slane %v2589_v34, 2  ;;  %v2593_v41 = vrot.slane %v2589_v34, 3  ;;  %v2598_v42 = vmul.f32 %v2589_v34, %v2493_v59 }
 0x7ad   : > { %v2599_v43 = vmul.f32 %v2591_v35, %v2494_v5  ;;  %v2600_v44 = vmul.f32 %v2592_v30, %v2495_v7  ;;  %v2601_v45 = vmul.f32 %v2593_v41, %v2496_v18  ;;  %2602 = vst.msk [vmem:[%s3783_s8 + $0x7] sm:$0x1] %vm655_vm7, %v2598_v42 }
 0x7af   : > { %2603 = vst.msk [vmem:[%s3783_s8 + $0xf] sm:$0x1] %vm655_vm7, %v2599_v43  ;;  %2604 = vst.msk [vmem:[%s3783_s8 + $0x17] sm:$0x1] %vm655_vm7, %v2600_v44 }
 0x7b0   : > { %2605 = vst.msk [vmem:[%s3783_s8 + $0x1f] sm:$0x1] %vm655_vm7, %v2601_v45 }
 0x7b1   : > { %3283 = shalt.err (!%p3280_p5)
}
 0x7b2   : > { %s3284_s8 = scalar_lea.hbm %s4177_s23, 512  ;;  %s3288_s15 = scalar_lea.hbm %s4266_s7, 2048 }
 0x7b3   : > { %p3285_p6 = scmp.ne.s32.totalorder %s4177_s23, %s3284_s8  ;;  %p3289_p11 = scmp.lt.s32.totalorder %s4177_s23, %s4266_s7 }
 0x7b4   : > { %p3290_p13 = scmp.lt.s32.totalorder %s3288_s15, %s3284_s8 }
 0x7b5   : > { %p3286_p7 = pnand %p3285_p6, %p3488_p9 }
 0x7b6   : > { %p3291_p3 = por %p3290_p13, %p3289_p11 }
 0x7b7   : > { %p3287_p10 = pneg %p3286_p7 }
 0x7b9   : > { %p3292_p8 = pnand %p3291_p3, %p3287_p10 }
 0x7bb   : > { %3295 = shalt.err (!%p3292_p8)
}
 0x7bc   : > { %s3386_s6 = smov 128   ;;  %s3387_s17 = smov 256  }
 0x7bd   : > { %s3388_s20 = smov 8  }
 0x7be   : > { %3120 = dma.vmem_to_hbm [thread:$0]  (%p3488_p9), %s4179_s19, 512, %s4177_s23, %s2607_s24, %s3386_s6, %s3387_s17, %s3388_s20  }
 0x7bf PF: > { %s4267_s29 = sld [smem:[#allocation14_spill]]  ;;  %p3126_p0 = scmp.ge.s32.totalorder %s3370_s28, 2 }
 0x7c1   : > { %p3123_p1 = pnand %p3126_p0, %p3495_p12 }
 0x7c3   : > { %p3124_p2 = pneg %p3123_p1 }
 0x7c5   : > { %s2636_s9 = sand.u32 1, %s4267_s29  }
 0x7c6   : > { %s2637_s25 = scalar_lea.sflag [#allocation4], %s2636_s9 }
 0x7c7   : > { %3337 = dma.done.wait (%p3124_p2), %s2637_s25, 512  }
 0x7c8   : > { %3339 = vsyncadd (%p3124_p2), %s2637_s25, 4294966784  ;;  %s25_s28 = sadd.s32 1, %s3370_s28   ;;  %s4269_s10 = sld [smem:[#allocation15_spill]] }
 0x7c9   : > { %p22_p4 = scmp.ge.s32.totalorder %s25_s28, 6   ;;  %s4270_s23 = sld [smem:[#allocation19_spill]] }
 0x7ca   : > { %s4271_s12 = sld [smem:[#allocation16_spill]]  ;;  %s4273_s21 = smov %s3346_s22 }
 0x7cb   : > { %s4272_s18 = sld [smem:[#allocation17_spill]]  ;;  %s4275_s24 = smov %s3362_s26 }
 0x7cc   : > { %s4276_s25 = smov %s3366_s27 }
 0x7cd   :  { %24 = sbr.rel (!%p22_p4) target bundleno = 12 (0xc), region = 107 }
 0x7ce   : > { %s4274_s22 = smov %s4269_s10 }
 0x7d0   : > { %s4277_s26 = smov %s4271_s12 }
 0x7d1   : > { %s4278_s27 = smov %s4272_s18 }
 0x7d2   :  { %2642 = vsyncpa [#allocation3], 1 }
 0x7d3   :  { %2644 = vsyncpa [#allocation3 + $0x1], 1 }
 0x7d4   :  { %2645 = vsyncpa [#allocation6], 1 }
 0x7d5   :  { %2647 = vsyncpa [#allocation6 + $0x1], 1 }
 0x7d6   :  { %2648 = vsyncpa [#allocation4], 1 }
 0x7d7   :  { %2650 = vsyncpa [#allocation4 + $0x1], 1 }

</bundles_post_ra>
